<compile_context>
chip_gen: v7x
topology: tpu7x:2x2x1
jax: 0.10.0
libtpu: 0.0.40
codegen_flags: <defaults>
</compile_context>

<pallas_src>
import functools

import jax
import jax.numpy as jnp
import numpy as np
from jax import lax
from jax.experimental import pallas as pl
from jax.experimental.pallas import tpu as pltpu

EPS = 1e-5  # nn.GroupNorm default eps


def _block_kernel(*refs, has_scale_shift, w_p, tile_h, npix):
    """Grid = (batch, pass, row_tile).  Pass 0: conv + stats.  Pass 1: apply."""
    if has_scale_shift:
        (x_ref, w_ref, b_ref, gamma_ref, beta_ref, gavg_ref, mask_ref,
         scale_ref, shift_ref, o_ref, s1_ref, s2_ref, m_ref, a_ref) = refs
    else:
        (x_ref, w_ref, b_ref, gamma_ref, beta_ref, gavg_ref, mask_ref,
         o_ref, s1_ref, s2_ref, m_ref, a_ref) = refs

    p = pl.program_id(1)          # 0 = stats pass, 1 = apply pass
    t = pl.program_id(2)          # spatial row tile
    m_rows = tile_h * w_p         # rows of the (flattened) output tile

    # ---- 3x3 conv on this row tile: 9 shifted-slice matmuls, f32 accumulate.
    # x_ref is the flattened (L_in, C_in_p) halo window; tap (kh, kw) is just a
    # constant row shift of kh*w_p + kw.  Bias is NOT added here (folded later).
    acc = None
    for kh in range(3):
        for kw in range(3):
            s = kh * w_p + kw
            xs = x_ref[s:s + m_rows, :]
            part = jnp.dot(xs, w_ref[kh * 3 + kw],
                           preferred_element_type=jnp.float32)
            acc = part if acc is None else acc + part          # (m_rows, C_pad)

    # ---- pass 0: accumulate masked per-channel sum / sum-of-squares --------
    @pl.when(jnp.logical_and(p == 0, t == 0))
    def _():
        s1_ref[...] = jnp.zeros_like(s1_ref)
        s2_ref[...] = jnp.zeros_like(s2_ref)

    @pl.when(p == 0)
    def _():
        # Masked column sums via a (1, M) @ (M, C_pad) matvec: the 0/1 mask row
        # simultaneously excludes the two pad columns per image row (free).
        mask = mask_ref[...]
        s1_ref[...] += jnp.dot(mask, acc, preferred_element_type=jnp.float32)
        s2_ref[...] += jnp.dot(mask, acc * acc,
                               preferred_element_type=jnp.float32)

    # ---- start of pass 1: finalize group stats -> per-channel (m, a) fold ---
    @pl.when(jnp.logical_and(p == 1, t == 0))
    def _():
        b = b_ref[...]                                   # (1, C_pad) conv bias
        s1 = s1_ref[...]
        s1b = s1 + npix * b                              # add bias to the sums
        s2b = s2_ref[...] + 2.0 * b * s1 + npix * b * b
        # Fused stats matmul: one (2, C) @ (C, C) group-averaging matmul.
        stacked = jnp.concatenate([s1b, s2b], axis=0)    # (2, C_pad)
        mm = jnp.dot(stacked, gavg_ref[...],
                     preferred_element_type=jnp.float32)
        mean_c = mm[0:1, :]
        var_c = jnp.maximum(mm[1:2, :] - mean_c * mean_c, 0.0)
        g = gamma_ref[...] * lax.rsqrt(var_c + EPS)
        if has_scale_shift:
            sp1 = scale_ref[...] + 1.0
            m_ref[...] = g * sp1
            a_ref[...] = ((b - mean_c) * g + beta_ref[...]) * sp1 + shift_ref[...]
        else:
            m_ref[...] = g
            a_ref[...] = (b - mean_c) * g + beta_ref[...]

    # ---- pass 1: normalize + affine (+scale/shift) + SiLU, one FMA tail ----
    @pl.when(p == 1)
    def _():
        y = acc * m_ref[...] + a_ref[...]
        o_ref[...] = (y * jax.nn.sigmoid(y)).astype(o_ref.dtype)


def _const_spec(shape):
    """BlockSpec for a grid-invariant operand; single-buffered when supported."""
    idx = lambda b, p, t: (0,) * len(shape)
    try:
        return pl.BlockSpec(shape, idx, pipeline_mode=pl.Buffered(1))
    except Exception:  # older jax without pipeline_mode -> default buffering
        return pl.BlockSpec(shape, idx)


def block_forward(x_nchw, conv_w, conv_b, gn_w, gn_b, groups, scale_shift=None,
                  compute_dtype=jnp.bfloat16, tile_h=None):
    """Pallas forward of Block.

    x_nchw : (B, C_in, H, W) float32
    conv_w : (C_out, C_in, 3, 3)  (PyTorch OIHW)
    conv_b, gn_w, gn_b : (C_out,)
    scale_shift : optional ((B, C_out, 1, 1), (B, C_out, 1, 1))
    compute_dtype : MXU operand dtype (bf16 default, f32 accumulate).
    tile_h : spatial row-tile height (must divide H); None -> auto.
    returns (B, C_out, H, W) float32
    """
    B, C_in, H, W = x_nchw.shape
    C_out = conv_w.shape[0]
    assert C_out % groups == 0
    cpg = C_out // groups
    C_pad = ((C_out + 127) // 128) * 128        # lane-dense output channels
    C_in_p = ((C_in + 7) // 8) * 8              # small K pad for clean layout
    W_p = W + 2                                 # left + right zero pad columns

    # ---- pick a row tile that keeps the per-step working set small ----------
    if tile_h is None:
        max_m = max(W_p, (24 * 1024 * 1024) // (16 * C_pad))   # ~24 MiB budget
        cands = [th for th in range(1, H + 1)
                 if H % th == 0 and (th == H or (th * W_p) % 8 == 0)
                 and th * W_p <= max_m]
        tile_h = max(cands) if cands else H
    assert H % tile_h == 0, "tile_h must divide H"
    n_tiles = H // tile_h
    assert n_tiles == 1 or (tile_h * W_p) % 8 == 0
    M = tile_h * W_p                          # flattened rows per output tile
    L_in = (tile_h + 3) * W_p                 # flattened rows per halo window

    # ---- halo'd, flattened NHWC row-tile windows (no 9x im2col blowup) ------
    x_nhwc = jnp.transpose(x_nchw, (0, 2, 3, 1))
    x_pad = jnp.pad(x_nhwc, ((0, 0), (1, 2), (1, 1), (0, C_in_p - C_in)))
    x_flat = x_pad.reshape(B, (H + 3) * W_p, C_in_p).astype(compute_dtype)
    x_win = jnp.stack(
        [x_flat[:, t * tile_h * W_p: t * tile_h * W_p + L_in, :]
         for t in range(n_tiles)], axis=1)    # (B, n_tiles, L_in, C_in_p)

    # ---- weights: OIHW -> (9 taps, C_in_p, C_pad) ---------------------------
    w = jnp.transpose(conv_w, (2, 3, 1, 0)).reshape(9, C_in, C_out)
    w = jnp.pad(w, ((0, 0), (0, C_in_p - C_in), (0, C_pad - C_out)))
    w = w.astype(compute_dtype)

    def _row(v):
        return jnp.pad(v.reshape(1, C_out).astype(jnp.float32),
                       ((0, 0), (0, C_pad - C_out)))

    b_row, gamma, beta = _row(conv_b), _row(gn_w), _row(gn_b)

    # Group-averaging matrix (static, padded channels masked out).
    ch = np.arange(C_pad)
    grp = ch // cpg
    same = (grp[:, None] == grp[None, :]) & (ch[:, None] < C_out) & (ch[None, :] < C_out)
    gavg = jnp.asarray(same.astype(np.float32) / float(cpg * H * W))

    # 0/1 mask of real (non-pad) columns within a flattened row tile.
    col = np.arange(M) % W_p
    mask = jnp.asarray((col < W).astype(np.float32).reshape(1, M))

    has_ss = scale_shift is not None

    inputs = [x_win, w, b_row, gamma, beta, gavg, mask]
    in_specs = [
        pl.BlockSpec((None, None, L_in, C_in_p), lambda b, p, t: (b, t, 0, 0)),
        _const_spec((9, C_in_p, C_pad)),
        _const_spec((1, C_pad)),
        _const_spec((1, C_pad)),
        _const_spec((1, C_pad)),
        _const_spec((C_pad, C_pad)),
        _const_spec((1, M)),
    ]
    if has_ss:
        scale, shift = scale_shift
        scale = jnp.pad(scale.reshape(B, 1, C_out).astype(jnp.float32),
                        ((0, 0), (0, 0), (0, C_pad - C_out)))
        shift = jnp.pad(shift.reshape(B, 1, C_out).astype(jnp.float32),
                        ((0, 0), (0, 0), (0, C_pad - C_out)))
        inputs += [scale, shift]
        in_specs += [pl.BlockSpec((None, 1, C_pad), lambda b, p, t: (b, 0, 0)),
                     pl.BlockSpec((None, 1, C_pad), lambda b, p, t: (b, 0, 0))]

    kernel = functools.partial(_block_kernel, has_scale_shift=has_ss,
                               w_p=W_p, tile_h=tile_h, npix=float(H * W))

    out = pl.pallas_call(
        kernel,
        out_shape=jax.ShapeDtypeStruct((B, H * W_p, C_pad), jnp.float32),
        grid_spec=pltpu.PrefetchScalarGridSpec(
            num_scalar_prefetch=0,
            grid=(B, 2, n_tiles),
            in_specs=in_specs,
            # Pass 0 parks the output window on tile 0 (never written there);
            # pass 1 revisits and fully writes every tile -> no garbage flushes.
            out_specs=pl.BlockSpec((None, M, C_pad),
                                   lambda b, p, t: (b, p * t, 0)),
            scratch_shapes=[
                pltpu.VMEM((1, C_pad), jnp.float32),   # running sum
                pltpu.VMEM((1, C_pad), jnp.float32),   # running sum of squares
                pltpu.VMEM((1, C_pad), jnp.float32),   # folded multiplier m
                pltpu.VMEM((1, C_pad), jnp.float32),   # folded adder a
            ]),
        compiler_params=pltpu.CompilerParams(
            dimension_semantics=("parallel", "arbitrary", "arbitrary"),
            vmem_limit_bytes=56 * 1024 * 1024),
    )(*inputs)

    out = out.reshape(B, H, W_p, C_pad)[:, :, :W, :C_out]
    return jnp.transpose(out, (0, 3, 1, 2))  # back to NCHW


# ------------------------- pure-JAX reference --------------------------------
def block_reference(x, conv_w, conv_b, gn_w, gn_b, groups, scale_shift=None):
    B, C_in, H, W = x.shape
    C_out = conv_w.shape[0]
    y = lax.conv_general_dilated(
        x, conv_w, window_strides=(1, 1), padding=((1, 1), (1, 1)),
        dimension_numbers=("NCHW", "OIHW", "NCHW"))
    y = y + conv_b.reshape(1, C_out, 1, 1)
    cpg = C_out // groups
    yg = y.reshape(B, groups, cpg, H, W)
    mean = yg.mean(axis=(2, 3, 4), keepdims=True)
    var = yg.var(axis=(2, 3, 4), keepdims=True)
    yg = (yg - mean) / jnp.sqrt(var + EPS)
    y = yg.reshape(B, C_out, H, W)
    y = y * gn_w.reshape(1, C_out, 1, 1) + gn_b.reshape(1, C_out, 1, 1)
    if scale_shift is not None:
        scale, shift = scale_shift
        y = y * (scale + 1.0) + shift
    return y * jax.nn.sigmoid(y)


if __name__ == "__main__":
    B, C_in, C_out, H, W = 2, 4, 16, 16, 16
    groups = 8

    key = jax.random.PRNGKey(0)
    k_x, k_w, k_b, k_s, k_sh = jax.random.split(key, 5)

    x = jax.random.normal(k_x, (B, C_in, H, W), jnp.float32)
    fan_in = C_in * 9
    bound = 1.0 / np.sqrt(fan_in)
    conv_w = jax.random.uniform(k_w, (C_out, C_in, 3, 3), jnp.float32, -bound, bound)
    conv_b = jax.random.uniform(k_b, (C_out,), jnp.float32, -bound, bound)
    gn_w = jnp.ones((C_out,), jnp.float32)
    gn_b = jnp.zeros((C_out,), jnp.float32)

    # --- path 1: f32 operands, explicit 2 row tiles, no scale_shift (tight) ---
    out = block_forward(x, conv_w, conv_b, gn_w, gn_b, groups, scale_shift=None,
                        compute_dtype=jnp.float32, tile_h=8)
    out = jax.block_until_ready(out)
    ref = block_reference(x, conv_w, conv_b, gn_w, gn_b, groups, None)
    np.testing.assert_allclose(np.asarray(out), np.asarray(ref),
                               rtol=1e-4, atol=1e-4)

    # --- path 2: with scale_shift, f32 operands, tiled (tight) ---
    scale = 0.1 * jax.random.normal(k_s, (B, C_out, 1, 1), jnp.float32)
    shift = 0.1 * jax.random.normal(k_sh, (B, C_out, 1, 1), jnp.float32)
    out2 = block_forward(x, conv_w, conv_b, gn_w, gn_b, groups,
                         scale_shift=(scale, shift),
                         compute_dtype=jnp.float32, tile_h=8)
    out2 = jax.block_until_ready(out2)
    ref2 = block_reference(x, conv_w, conv_b, gn_w, gn_b, groups, (scale, shift))
    np.testing.assert_allclose(np.asarray(out2), np.asarray(ref2),
                               rtol=1e-4, atol=1e-4)

    # --- path 3: default bf16 MXU operands, auto row tile (loose) ---
    out3 = block_forward(x, conv_w, conv_b, gn_w, gn_b, groups,
                         scale_shift=(scale, shift))
    out3 = jax.block_until_ready(out3)
    np.testing.assert_allclose(np.asarray(out3), np.asarray(ref2),
                               rtol=1e-1, atol=1e-1)

    print("KERNEL_OK")
</pallas_src>

<mosaic_0001>
module attributes {stable_mosaic.version = 11 : i64} {
  func.func @_block_kernel(%arg0: i32, %arg1: i32, %arg2: i32, %arg3: memref<1x1x198x8xf32, #tpu.memory_space<vmem>>, %arg4: memref<9x8x128xf32, #tpu.memory_space<vmem>>, %arg5: memref<1x128xf32, #tpu.memory_space<vmem>>, %arg6: memref<1x128xf32, #tpu.memory_space<vmem>>, %arg7: memref<1x128xf32, #tpu.memory_space<vmem>>, %arg8: memref<128x128xf32, #tpu.memory_space<vmem>>, %arg9: memref<1x144xf32, #tpu.memory_space<vmem>>, %arg10: memref<1x144x128xf32, #tpu.memory_space<vmem>>, %arg11: memref<1x128xf32, #tpu.memory_space<vmem>>, %arg12: memref<1x128xf32, #tpu.memory_space<vmem>>, %arg13: memref<1x128xf32, #tpu.memory_space<vmem>>, %arg14: memref<1x128xf32, #tpu.memory_space<vmem>>) attributes {dimension_semantics = [#tpu.dimension_semantics<parallel>, #tpu.dimension_semantics<arbitrary>, #tpu.dimension_semantics<arbitrary>], iteration_bounds = array<i64: 2, 2, 2>, scalar_prefetch = 0 : i64, scratch_operands = 4 : i64, tpu.core_type = #tpu.core_type<tc>, window_params = [{transform_indices = @transform_0, window_bounds = array<i64: 1, 1, 198, 8>}, {pipeline_mode = #tpu.pipeline_mode<synchronous>, transform_indices = @transform_1, window_bounds = array<i64: 9, 8, 128>}, {pipeline_mode = #tpu.pipeline_mode<synchronous>, transform_indices = @transform_2, window_bounds = array<i64: 1, 128>}, {pipeline_mode = #tpu.pipeline_mode<synchronous>, transform_indices = @transform_3, window_bounds = array<i64: 1, 128>}, {pipeline_mode = #tpu.pipeline_mode<synchronous>, transform_indices = @transform_4, window_bounds = array<i64: 1, 128>}, {pipeline_mode = #tpu.pipeline_mode<synchronous>, transform_indices = @transform_5, window_bounds = array<i64: 128, 128>}, {pipeline_mode = #tpu.pipeline_mode<synchronous>, transform_indices = @transform_6, window_bounds = array<i64: 1, 144>}, {transform_indices = @transform_7, window_bounds = array<i64: 1, 144, 128>}]} {
    %c0 = arith.constant 0 : index
    %c0_0 = arith.constant 0 : index
    %c0_1 = arith.constant 0 : index
    %c0_2 = arith.constant 0 : index
    %0 = vector.load %arg3[%c0, %c0_0, %c0_1, %c0_2] : memref<1x1x198x8xf32, #tpu.memory_space<vmem>>, vector<1x1x144x8xf32>
    %1 = vector.shape_cast %0 : vector<1x1x144x8xf32> to vector<144x8xf32>
    %c0_3 = arith.constant 0 : index
    %c0_4 = arith.constant 0 : index
    %c0_5 = arith.constant 0 : index
    %2 = vector.load %arg4[%c0_3, %c0_4, %c0_5] : memref<9x8x128xf32, #tpu.memory_space<vmem>>, vector<1x8x128xf32>
    %3 = vector.shape_cast %2 : vector<1x8x128xf32> to vector<8x128xf32>
    %cst = arith.constant dense<0.000000e+00> : vector<144x128xf32>
    %4 = tpu.matmul %1, %3, %cst {dimension_numbers = #tpu.dot_dimension_numbers<[1], [0], [0], [1], [0, 0, 1, 1], [], []>} : vector<144x8xf32>, vector<8x128xf32>, vector<144x128xf32> -> vector<144x128xf32>
    %c0_6 = arith.constant 0 : index
    %c0_7 = arith.constant 0 : index
    %c1 = arith.constant 1 : index
    %c0_8 = arith.constant 0 : index
    %5 = vector.load %arg3[%c0_6, %c0_7, %c1, %c0_8] : memref<1x1x198x8xf32, #tpu.memory_space<vmem>>, vector<1x1x144x8xf32>
    %6 = vector.shape_cast %5 : vector<1x1x144x8xf32> to vector<144x8xf32>
    %c1_9 = arith.constant 1 : index
    %c0_10 = arith.constant 0 : index
    %c0_11 = arith.constant 0 : index
    %7 = vector.load %arg4[%c1_9, %c0_10, %c0_11] : memref<9x8x128xf32, #tpu.memory_space<vmem>>, vector<1x8x128xf32>
    %8 = vector.shape_cast %7 : vector<1x8x128xf32> to vector<8x128xf32>
    %cst_12 = arith.constant dense<0.000000e+00> : vector<144x128xf32>
    %9 = tpu.matmul %6, %8, %cst_12 {dimension_numbers = #tpu.dot_dimension_numbers<[1], [0], [0], [1], [0, 0, 1, 1], [], []>} : vector<144x8xf32>, vector<8x128xf32>, vector<144x128xf32> -> vector<144x128xf32>
    %10 = arith.addf %4, %9 : vector<144x128xf32>
    %c0_13 = arith.constant 0 : index
    %c0_14 = arith.constant 0 : index
    %c2 = arith.constant 2 : index
    %c0_15 = arith.constant 0 : index
    %11 = vector.load %arg3[%c0_13, %c0_14, %c2, %c0_15] : memref<1x1x198x8xf32, #tpu.memory_space<vmem>>, vector<1x1x144x8xf32>
    %12 = vector.shape_cast %11 : vector<1x1x144x8xf32> to vector<144x8xf32>
    %c2_16 = arith.constant 2 : index
    %c0_17 = arith.constant 0 : index
    %c0_18 = arith.constant 0 : index
    %13 = vector.load %arg4[%c2_16, %c0_17, %c0_18] : memref<9x8x128xf32, #tpu.memory_space<vmem>>, vector<1x8x128xf32>
    %14 = vector.shape_cast %13 : vector<1x8x128xf32> to vector<8x128xf32>
    %cst_19 = arith.constant dense<0.000000e+00> : vector<144x128xf32>
    %15 = tpu.matmul %12, %14, %cst_19 {dimension_numbers = #tpu.dot_dimension_numbers<[1], [0], [0], [1], [0, 0, 1, 1], [], []>} : vector<144x8xf32>, vector<8x128xf32>, vector<144x128xf32> -> vector<144x128xf32>
    %16 = arith.addf %10, %15 : vector<144x128xf32>
    %c0_20 = arith.constant 0 : index
    %c0_21 = arith.constant 0 : index
    %c18 = arith.constant 18 : index
    %c0_22 = arith.constant 0 : index
    %17 = vector.load %arg3[%c0_20, %c0_21, %c18, %c0_22] : memref<1x1x198x8xf32, #tpu.memory_space<vmem>>, vector<1x1x144x8xf32>
    %18 = vector.shape_cast %17 : vector<1x1x144x8xf32> to vector<144x8xf32>
    %c3 = arith.constant 3 : index
    %c0_23 = arith.constant 0 : index
    %c0_24 = arith.constant 0 : index
    %19 = vector.load %arg4[%c3, %c0_23, %c0_24] : memref<9x8x128xf32, #tpu.memory_space<vmem>>, vector<1x8x128xf32>
    %20 = vector.shape_cast %19 : vector<1x8x128xf32> to vector<8x128xf32>
    %cst_25 = arith.constant dense<0.000000e+00> : vector<144x128xf32>
    %21 = tpu.matmul %18, %20, %cst_25 {dimension_numbers = #tpu.dot_dimension_numbers<[1], [0], [0], [1], [0, 0, 1, 1], [], []>} : vector<144x8xf32>, vector<8x128xf32>, vector<144x128xf32> -> vector<144x128xf32>
    %22 = arith.addf %16, %21 : vector<144x128xf32>
    %c0_26 = arith.constant 0 : index
    %c0_27 = arith.constant 0 : index
    %c19 = arith.constant 19 : index
    %c0_28 = arith.constant 0 : index
    %23 = vector.load %arg3[%c0_26, %c0_27, %c19, %c0_28] : memref<1x1x198x8xf32, #tpu.memory_space<vmem>>, vector<1x1x144x8xf32>
    %24 = vector.shape_cast %23 : vector<1x1x144x8xf32> to vector<144x8xf32>
    %c4 = arith.constant 4 : index
    %c0_29 = arith.constant 0 : index
    %c0_30 = arith.constant 0 : index
    %25 = vector.load %arg4[%c4, %c0_29, %c0_30] : memref<9x8x128xf32, #tpu.memory_space<vmem>>, vector<1x8x128xf32>
    %26 = vector.shape_cast %25 : vector<1x8x128xf32> to vector<8x128xf32>
    %cst_31 = arith.constant dense<0.000000e+00> : vector<144x128xf32>
    %27 = tpu.matmul %24, %26, %cst_31 {dimension_numbers = #tpu.dot_dimension_numbers<[1], [0], [0], [1], [0, 0, 1, 1], [], []>} : vector<144x8xf32>, vector<8x128xf32>, vector<144x128xf32> -> vector<144x128xf32>
    %28 = arith.addf %22, %27 : vector<144x128xf32>
    %c0_32 = arith.constant 0 : index
    %c0_33 = arith.constant 0 : index
    %c20 = arith.constant 20 : index
    %c0_34 = arith.constant 0 : index
    %29 = vector.load %arg3[%c0_32, %c0_33, %c20, %c0_34] : memref<1x1x198x8xf32, #tpu.memory_space<vmem>>, vector<1x1x144x8xf32>
    %30 = vector.shape_cast %29 : vector<1x1x144x8xf32> to vector<144x8xf32>
    %c5 = arith.constant 5 : index
    %c0_35 = arith.constant 0 : index
    %c0_36 = arith.constant 0 : index
    %31 = vector.load %arg4[%c5, %c0_35, %c0_36] : memref<9x8x128xf32, #tpu.memory_space<vmem>>, vector<1x8x128xf32>
    %32 = vector.shape_cast %31 : vector<1x8x128xf32> to vector<8x128xf32>
    %cst_37 = arith.constant dense<0.000000e+00> : vector<144x128xf32>
    %33 = tpu.matmul %30, %32, %cst_37 {dimension_numbers = #tpu.dot_dimension_numbers<[1], [0], [0], [1], [0, 0, 1, 1], [], []>} : vector<144x8xf32>, vector<8x128xf32>, vector<144x128xf32> -> vector<144x128xf32>
    %34 = arith.addf %28, %33 : vector<144x128xf32>
    %c0_38 = arith.constant 0 : index
    %c0_39 = arith.constant 0 : index
    %c36 = arith.constant 36 : index
    %c0_40 = arith.constant 0 : index
    %35 = vector.load %arg3[%c0_38, %c0_39, %c36, %c0_40] : memref<1x1x198x8xf32, #tpu.memory_space<vmem>>, vector<1x1x144x8xf32>
    %36 = vector.shape_cast %35 : vector<1x1x144x8xf32> to vector<144x8xf32>
    %c6 = arith.constant 6 : index
    %c0_41 = arith.constant 0 : index
    %c0_42 = arith.constant 0 : index
    %37 = vector.load %arg4[%c6, %c0_41, %c0_42] : memref<9x8x128xf32, #tpu.memory_space<vmem>>, vector<1x8x128xf32>
    %38 = vector.shape_cast %37 : vector<1x8x128xf32> to vector<8x128xf32>
    %cst_43 = arith.constant dense<0.000000e+00> : vector<144x128xf32>
    %39 = tpu.matmul %36, %38, %cst_43 {dimension_numbers = #tpu.dot_dimension_numbers<[1], [0], [0], [1], [0, 0, 1, 1], [], []>} : vector<144x8xf32>, vector<8x128xf32>, vector<144x128xf32> -> vector<144x128xf32>
    %40 = arith.addf %34, %39 : vector<144x128xf32>
    %c0_44 = arith.constant 0 : index
    %c0_45 = arith.constant 0 : index
    %c37 = arith.constant 37 : index
    %c0_46 = arith.constant 0 : index
    %41 = vector.load %arg3[%c0_44, %c0_45, %c37, %c0_46] : memref<1x1x198x8xf32, #tpu.memory_space<vmem>>, vector<1x1x144x8xf32>
    %42 = vector.shape_cast %41 : vector<1x1x144x8xf32> to vector<144x8xf32>
    %c7 = arith.constant 7 : index
    %c0_47 = arith.constant 0 : index
    %c0_48 = arith.constant 0 : index
    %43 = vector.load %arg4[%c7, %c0_47, %c0_48] : memref<9x8x128xf32, #tpu.memory_space<vmem>>, vector<1x8x128xf32>
    %44 = vector.shape_cast %43 : vector<1x8x128xf32> to vector<8x128xf32>
    %cst_49 = arith.constant dense<0.000000e+00> : vector<144x128xf32>
    %45 = tpu.matmul %42, %44, %cst_49 {dimension_numbers = #tpu.dot_dimension_numbers<[1], [0], [0], [1], [0, 0, 1, 1], [], []>} : vector<144x8xf32>, vector<8x128xf32>, vector<144x128xf32> -> vector<144x128xf32>
    %46 = arith.addf %40, %45 : vector<144x128xf32>
    %c0_50 = arith.constant 0 : index
    %c0_51 = arith.constant 0 : index
    %c38 = arith.constant 38 : index
    %c0_52 = arith.constant 0 : index
    %47 = vector.load %arg3[%c0_50, %c0_51, %c38, %c0_52] : memref<1x1x198x8xf32, #tpu.memory_space<vmem>>, vector<1x1x144x8xf32>
    %48 = vector.shape_cast %47 : vector<1x1x144x8xf32> to vector<144x8xf32>
    %c8 = arith.constant 8 : index
    %c0_53 = arith.constant 0 : index
    %c0_54 = arith.constant 0 : index
    %49 = vector.load %arg4[%c8, %c0_53, %c0_54] : memref<9x8x128xf32, #tpu.memory_space<vmem>>, vector<1x8x128xf32>
    %50 = vector.shape_cast %49 : vector<1x8x128xf32> to vector<8x128xf32>
    %cst_55 = arith.constant dense<0.000000e+00> : vector<144x128xf32>
    %51 = tpu.matmul %48, %50, %cst_55 {dimension_numbers = #tpu.dot_dimension_numbers<[1], [0], [0], [1], [0, 0, 1, 1], [], []>} : vector<144x8xf32>, vector<8x128xf32>, vector<144x128xf32> -> vector<144x128xf32>
    %52 = arith.addf %46, %51 : vector<144x128xf32>
    %c0_i32 = arith.constant 0 : i32
    %53 = arith.cmpi eq, %arg1, %c0_i32 : i32
    %c0_i32_56 = arith.constant 0 : i32
    %54 = arith.cmpi eq, %arg2, %c0_i32_56 : i32
    %55 = arith.andi %53, %54 : i1
    %56 = arith.extui %55 : i1 to i32
    %c0_i32_57 = arith.constant 0 : i32
    %57 = arith.cmpi ne, %56, %c0_i32_57 : i32
    scf.if %57 {
      %cst_64 = arith.constant 0.000000e+00 : f32
      %69 = vector.broadcast %cst_64 : f32 to vector<1x128xf32>
      %c0_65 = arith.constant 0 : index
      %c0_66 = arith.constant 0 : index
      %70 = vector.load %arg11[%c0_65, %c0_66] : memref<1x128xf32, #tpu.memory_space<vmem>>, vector<1x128xf32>
      tpu.vector_store %arg11[%c0_65, %c0_66], %69 {strides = array<i32>} : memref<1x128xf32, #tpu.memory_space<vmem>>, vector<1x128xf32>,
      %cst_67 = arith.constant 0.000000e+00 : f32
      %71 = vector.broadcast %cst_67 : f32 to vector<1x128xf32>
      %c0_68 = arith.constant 0 : index
      %c0_69 = arith.constant 0 : index
      %72 = vector.load %arg12[%c0_68, %c0_69] : memref<1x128xf32, #tpu.memory_space<vmem>>, vector<1x128xf32>
      tpu.vector_store %arg12[%c0_68, %c0_69], %71 {strides = array<i32>} : memref<1x128xf32, #tpu.memory_space<vmem>>, vector<1x128xf32>,
    } else {
    }
    %c0_i32_58 = arith.constant 0 : i32
    %58 = arith.cmpi eq, %arg1, %c0_i32_58 : i32
    %59 = arith.extui %58 : i1 to i32
    %c0_i32_59 = arith.constant 0 : i32
    %60 = arith.cmpi ne, %59, %c0_i32_59 : i32
    scf.if %60 {
      %c0_64 = arith.constant 0 : index
      %c0_65 = arith.constant 0 : index
      %69 = vector.load %arg9[%c0_64, %c0_65] : memref<1x144xf32, #tpu.memory_space<vmem>>, vector<1x144xf32>
      %c0_66 = arith.constant 0 : index
      %c0_67 = arith.constant 0 : index
      %70 = vector.load %arg11[%c0_66, %c0_67] : memref<1x128xf32, #tpu.memory_space<vmem>>, vector<1x128xf32>
      %cst_68 = arith.constant dense<0.000000e+00> : vector<1x128xf32>
      %71 = tpu.matmul %69, %52, %cst_68 {dimension_numbers = #tpu.dot_dimension_numbers<[1], [0], [0], [1], [0, 0, 1, 1], [], []>} : vector<1x144xf32>, vector<144x128xf32>, vector<1x128xf32> -> vector<1x128xf32>
      %72 = arith.addf %70, %71 : vector<1x128xf32>
      %c0_69 = arith.constant 0 : index
      %c0_70 = arith.constant 0 : index
      %73 = vector.load %arg11[%c0_69, %c0_70] : memref<1x128xf32, #tpu.memory_space<vmem>>, vector<1x128xf32>
      tpu.vector_store %arg11[%c0_69, %c0_70], %72 {strides = array<i32>} : memref<1x128xf32, #tpu.memory_space<vmem>>, vector<1x128xf32>,
      %c0_71 = arith.constant 0 : index
      %c0_72 = arith.constant 0 : index
      %74 = vector.load %arg12[%c0_71, %c0_72] : memref<1x128xf32, #tpu.memory_space<vmem>>, vector<1x128xf32>
      %75 = arith.mulf %52, %52 : vector<144x128xf32>
      %cst_73 = arith.constant dense<0.000000e+00> : vector<1x128xf32>
      %76 = tpu.matmul %69, %75, %cst_73 {dimension_numbers = #tpu.dot_dimension_numbers<[1], [0], [0], [1], [0, 0, 1, 1], [], []>} : vector<1x144xf32>, vector<144x128xf32>, vector<1x128xf32> -> vector<1x128xf32>
      %77 = arith.addf %74, %76 : vector<1x128xf32>
      %c0_74 = arith.constant 0 : index
      %c0_75 = arith.constant 0 : index
      %78 = vector.load %arg12[%c0_74, %c0_75] : memref<1x128xf32, #tpu.memory_space<vmem>>, vector<1x128xf32>
      tpu.vector_store %arg12[%c0_74, %c0_75], %77 {strides = array<i32>} : memref<1x128xf32, #tpu.memory_space<vmem>>, vector<1x128xf32>,
    } else {
    }
    %c1_i32 = arith.constant 1 : i32
    %61 = arith.cmpi eq, %arg1, %c1_i32 : i32
    %c0_i32_60 = arith.constant 0 : i32
    %62 = arith.cmpi eq, %arg2, %c0_i32_60 : i32
    %63 = arith.andi %61, %62 : i1
    %64 = arith.extui %63 : i1 to i32
    %c0_i32_61 = arith.constant 0 : i32
    %65 = arith.cmpi ne, %64, %c0_i32_61 : i32
    scf.if %65 {
      %c0_64 = arith.constant 0 : index
      %c0_65 = arith.constant 0 : index
      %69 = vector.load %arg5[%c0_64, %c0_65] : memref<1x128xf32, #tpu.memory_space<vmem>>, vector<1x128xf32>
      %c0_66 = arith.constant 0 : index
      %c0_67 = arith.constant 0 : index
      %70 = vector.load %arg11[%c0_66, %c0_67] : memref<1x128xf32, #tpu.memory_space<vmem>>, vector<1x128xf32>
      %cst_68 = arith.constant 2.560000e+02 : f32
      %71 = vector.broadcast %cst_68 : f32 to vector<1x128xf32>
      %72 = arith.mulf %71, %69 : vector<1x128xf32>
      %73 = arith.addf %70, %72 : vector<1x128xf32>
      %c0_69 = arith.constant 0 : index
      %c0_70 = arith.constant 0 : index
      %74 = vector.load %arg12[%c0_69, %c0_70] : memref<1x128xf32, #tpu.memory_space<vmem>>, vector<1x128xf32>
      %cst_71 = arith.constant 2.000000e+00 : f32
      %75 = vector.broadcast %cst_71 : f32 to vector<1x128xf32>
      %76 = arith.mulf %75, %69 : vector<1x128xf32>
      %77 = arith.mulf %76, %70 : vector<1x128xf32>
      %78 = arith.addf %74, %77 : vector<1x128xf32>
      %cst_72 = arith.constant 2.560000e+02 : f32
      %79 = vector.broadcast %cst_72 : f32 to vector<1x128xf32>
      %80 = arith.mulf %79, %69 : vector<1x128xf32>
      %81 = arith.mulf %80, %69 : vector<1x128xf32>
      %82 = arith.addf %78, %81 : vector<1x128xf32>
      %83 = tpu.concatenate %73, %82 in 0 : vector<1x128xf32>, vector<1x128xf32> -> vector<2x128xf32>
      %c0_73 = arith.constant 0 : index
      %c0_74 = arith.constant 0 : index
      %84 = vector.load %arg8[%c0_73, %c0_74] : memref<128x128xf32, #tpu.memory_space<vmem>>, vector<128x128xf32>
      %cst_75 = arith.constant dense<0.000000e+00> : vector<2x128xf32>
      %85 = tpu.matmul %83, %84, %cst_75 {dimension_numbers = #tpu.dot_dimension_numbers<[1], [0], [0], [1], [0, 0, 1, 1], [], []>} : vector<2x128xf32>, vector<128x128xf32>, vector<2x128xf32> -> vector<2x128xf32>
      %86 = vector.extract_strided_slice %85 {offsets = [0, 0], sizes = [1, 128], strides = [1, 1]} : vector<2x128xf32> to vector<1x128xf32>
      %87 = vector.extract_strided_slice %85 {offsets = [1, 0], sizes = [1, 128], strides = [1, 1]} : vector<2x128xf32> to vector<1x128xf32>
      %88 = arith.mulf %86, %86 : vector<1x128xf32>
      %89 = arith.subf %87, %88 : vector<1x128xf32>
      %cst_76 = arith.constant 0.000000e+00 : f32
      %90 = vector.broadcast %cst_76 : f32 to vector<1x128xf32>
      %91 = arith.maximumf %89, %90 : vector<1x128xf32>
      %c0_77 = arith.constant 0 : index
      %c0_78 = arith.constant 0 : index
      %92 = vector.load %arg6[%c0_77, %c0_78] : memref<1x128xf32, #tpu.memory_space<vmem>>, vector<1x128xf32>
      %cst_79 = arith.constant 9.99999974E-6 : f32
      %93 = vector.broadcast %cst_79 : f32 to vector<1x128xf32>
      %94 = arith.addf %91, %93 : vector<1x128xf32>
      %95 = math.rsqrt %94 : vector<1x128xf32>
      %96 = arith.mulf %92, %95 : vector<1x128xf32>
      %c0_80 = arith.constant 0 : index
      %c0_81 = arith.constant 0 : index
      %97 = vector.load %arg13[%c0_80, %c0_81] : memref<1x128xf32, #tpu.memory_space<vmem>>, vector<1x128xf32>
      tpu.vector_store %arg13[%c0_80, %c0_81], %96 {strides = array<i32>} : memref<1x128xf32, #tpu.memory_space<vmem>>, vector<1x128xf32>,
      %98 = arith.subf %69, %86 : vector<1x128xf32>
      %99 = arith.mulf %98, %96 : vector<1x128xf32>
      %c0_82 = arith.constant 0 : index
      %c0_83 = arith.constant 0 : index
      %100 = vector.load %arg7[%c0_82, %c0_83] : memref<1x128xf32, #tpu.memory_space<vmem>>, vector<1x128xf32>
      %101 = arith.addf %99, %100 : vector<1x128xf32>
      %c0_84 = arith.constant 0 : index
      %c0_85 = arith.constant 0 : index
      %102 = vector.load %arg14[%c0_84, %c0_85] : memref<1x128xf32, #tpu.memory_space<vmem>>, vector<1x128xf32>
      tpu.vector_store %arg14[%c0_84, %c0_85], %101 {strides = array<i32>} : memref<1x128xf32, #tpu.memory_space<vmem>>, vector<1x128xf32>,
    } else {
    }
    %c1_i32_62 = arith.constant 1 : i32
    %66 = arith.cmpi eq, %arg1, %c1_i32_62 : i32
    %67 = arith.extui %66 : i1 to i32
    %c0_i32_63 = arith.constant 0 : i32
    %68 = arith.cmpi ne, %67, %c0_i32_63 : i32
    scf.if %68 {
      %c0_64 = arith.constant 0 : index
      %c0_65 = arith.constant 0 : index
      %69 = vector.load %arg13[%c0_64, %c0_65] : memref<1x128xf32, #tpu.memory_space<vmem>>, vector<1x128xf32>
      %70 = vector.broadcast %69 : vector<1x128xf32> to vector<144x128xf32>
      %71 = arith.mulf %52, %70 : vector<144x128xf32>
      %c0_66 = arith.constant 0 : index
      %c0_67 = arith.constant 0 : index
      %72 = vector.load %arg14[%c0_66, %c0_67] : memref<1x128xf32, #tpu.memory_space<vmem>>, vector<1x128xf32>
      %73 = vector.broadcast %72 : vector<1x128xf32> to vector<144x128xf32>
      %74 = arith.addf %71, %73 : vector<144x128xf32>
      %75 = arith.negf %74 : vector<144x128xf32>
      %76 = math.exp %75 : vector<144x128xf32>
      %cst_68 = arith.constant 1.000000e+00 : f32
      %77 = vector.broadcast %cst_68 : f32 to vector<144x128xf32>
      %78 = arith.addf %77, %76 : vector<144x128xf32>
      %79 = arith.divf %77, %78 : vector<144x128xf32>
      %80 = arith.mulf %74, %79 : vector<144x128xf32>
      %c0_69 = arith.constant 0 : index
      %c0_70 = arith.constant 0 : index
      %c0_71 = arith.constant 0 : index
      %81 = vector.load %arg10[%c0_69, %c0_70, %c0_71] : memref<1x144x128xf32, #tpu.memory_space<vmem>>, vector<1x144x128xf32>
      %82 = vector.shape_cast %81 : vector<1x144x128xf32> to vector<144x128xf32>
      %83 = vector.shape_cast %80 : vector<144x128xf32> to vector<1x144x128xf32>
      tpu.vector_store %arg10[%c0_69, %c0_70, %c0_71], %83 {strides = array<i32>} : memref<1x144x128xf32, #tpu.memory_space<vmem>>, vector<1x144x128xf32>,
    } else {
    }
    return
  }
  func.func @transform_0(%arg0: i32, %arg1: i32, %arg2: i32) -> (i32, i32, i32, i32) {
    %c0_i32 = arith.constant 0 : i32
    %c0_i32_0 = arith.constant 0 : i32
    %c0_i32_1 = arith.constant 0 : i32
    return %arg0, %arg2, %c0_i32, %c0_i32_0 : i32, i32, i32, i32
  }
  func.func @transform_1(%arg0: i32, %arg1: i32, %arg2: i32) -> (i32, i32, i32) {
    %c0_i32 = arith.constant 0 : i32
    %c0_i32_0 = arith.constant 0 : i32
    %c0_i32_1 = arith.constant 0 : i32
    %c0_i32_2 = arith.constant 0 : i32
    return %c0_i32, %c0_i32_0, %c0_i32_1 : i32, i32, i32
  }
  func.func @transform_2(%arg0: i32, %arg1: i32, %arg2: i32) -> (i32, i32) {
    %c0_i32 = arith.constant 0 : i32
    %c0_i32_0 = arith.constant 0 : i32
    %c0_i32_1 = arith.constant 0 : i32
    return %c0_i32, %c0_i32_0 : i32, i32
  }
  func.func @transform_3(%arg0: i32, %arg1: i32, %arg2: i32) -> (i32, i32) {
    %c0_i32 = arith.constant 0 : i32
    %c0_i32_0 = arith.constant 0 : i32
    %c0_i32_1 = arith.constant 0 : i32
    return %c0_i32, %c0_i32_0 : i32, i32
  }
  func.func @transform_4(%arg0: i32, %arg1: i32, %arg2: i32) -> (i32, i32) {
    %c0_i32 = arith.constant 0 : i32
    %c0_i32_0 = arith.constant 0 : i32
    %c0_i32_1 = arith.constant 0 : i32
    return %c0_i32, %c0_i32_0 : i32, i32
  }
  func.func @transform_5(%arg0: i32, %arg1: i32, %arg2: i32) -> (i32, i32) {
    %c0_i32 = arith.constant 0 : i32
    %c0_i32_0 = arith.constant 0 : i32
    %c0_i32_1 = arith.constant 0 : i32
    return %c0_i32, %c0_i32_0 : i32, i32
  }
  func.func @transform_6(%arg0: i32, %arg1: i32, %arg2: i32) -> (i32, i32) {
    %c0_i32 = arith.constant 0 : i32
    %c0_i32_0 = arith.constant 0 : i32
    %c0_i32_1 = arith.constant 0 : i32
    return %c0_i32, %c0_i32_0 : i32, i32
  }
  func.func @transform_7(%arg0: i32, %arg1: i32, %arg2: i32) -> (i32, i32, i32) {
    %0 = arith.muli %arg1, %arg2 : i32
    %c0_i32 = arith.constant 0 : i32
    %c0_i32_0 = arith.constant 0 : i32
    return %arg0, %0, %c0_i32 : i32, i32, i32
  }
}

</mosaic_0001>

<bundles_post_ra>
// kernel: tpu_custom_call.1
= control target key start
LH: loop header
LB: loop body
LE: loop exit
PB: predicated region body
PF: predicated region fallthrough
CT: control target
= control target key end

     0   :  { %s5293_s0 = inlined_call_operand.vmem [shape: f32[2,2,198,8], index: 0, kind: input, shape index: {}]   ;;  %s5294_s1 = inlined_call_operand.vmem [shape: f32[9,8,128], index: 1, kind: input, shape index: {}]   ;;  %s5295_s2 = inlined_call_operand.vmem [shape: f32[1,128], index: 2, kind: input, shape index: {}]   ;;  %s5296_s3 = inlined_call_operand.vmem [shape: f32[1,128], index: 3, kind: input, shape index: {}]   ;;  %s5297_s4 = inlined_call_operand.vmem [shape: f32[1,128], index: 4, kind: input, shape index: {}]   ;;  %s5298_s5 = inlined_call_operand.vmem [shape: f32[128,128], index: 5, kind: input, shape index: {}]   ;;  %s5299_s6 = inlined_call_operand.vmem [shape: f32[1,144], index: 6, kind: input, shape index: {}]   ;;  %s5300_s7 = inlined_call_operand.hbm [shape: f32[2,288,128], index: 7, kind: output, shape index: {}]  }
   0x1   :  { %5307 = sst [smem:[#allocation14_spill]] %s5293_s0 }
   0x2   :  { %12 = vsyncpa [#allocation7], 0 }
   0x3   :  { %14 = vsyncpa [#allocation7 + $0x1], 0  ;;  %s4384_s24 = smov 0   ;;  %s4386_s25 = smov 0  }
   0x4   :  { %s4388_s26 = smov 0   ;;  %s4390_s27 = smov 0  }
   0x5   :  { %s4392_s28 = smov 0   ;;  %s4394_s29 = smov 0  }
   0x6   :  { %s4396_s30 = smov 0   ;;  %s4398_s8 = smov 0  }
   0x7   :  { %s4400_s9 = smov 0   ;;  %s4402_s10 = smov 0  }
   0x8 LB: > { %5308 = sst [smem:[#allocation9_spill]] %s4325_s8  ;;  %s3139_s11 = sadd.s32 4294967295, %s4333_s10   ;;  %s4333_s10 = sphi %s4402_s10, %s20_s10   ;;  %s4329_s9 = sphi %s4400_s9, %s5322_s9   ;;  %s4325_s8 = sphi %s4398_s8, %s5321_s8   ;;  %s4321_s30 = sphi %s4396_s30, %s5327_s30   ;;  %s4317_s29 = sphi %s4394_s29, %s5319_s29   ;;  %s4313_s28 = sphi %s4392_s28, %s5318_s28   ;;  %s4309_s27 = sphi %s4390_s27, %s5326_s27   ;;  %s4305_s26 = sphi %s4388_s26, %s5325_s26   ;;  %s4301_s25 = sphi %s4386_s25, %s5324_s25   ;;  %s4297_s24 = sphi %s4384_s24, %s5323_s24  }
   0x9   : > { %5309 = sst [smem:[#allocation10_spill]] %s4329_s9  ;;  %s3140_s12 = sadd.s32 4294967294, %s4333_s10  }
   0xa   : > { %s32_s13 = sadd.s32 1, %s4321_s30  ;;  %s35_s14 = sadd.s32 1, %s4325_s8 }
   0xb   : > { %p33_p0 = scmp.ge.s32.totalorder %s32_s13, 2  ;;  %s39_s15 = sadd.s32 1, %s4329_s9 }
   0xc   : > { %s197_s16 = smul.u32 %s4321_s30, %s4325_s8  ;;  %p214_p1 = scmp.ne.s32.totalorder %s4305_s26, %s4301_s25 }
   0xd   : > { %s5329_s13 = smov (%p33_p0, %s32_s13), 0  ;;  %s5331_s14 = smov (!%p33_p0, %s35_s14), %s4325_s8 }
   0xe   : > { %5310 = sst [smem:[#allocation11_spill]] %s5329_s13  ;;  %p215_p2 = scmp.eq.s32.totalorder %s3139_s11, 7 }
   0xf   : > { %p37_p3 = scmp.ge.s32.totalorder %s5331_s14, 2  ;;  %p220_p4 = scmp.ne.s32.totalorder %s4301_s25, %s4297_s24 }
  0x10   : > { %p4448_p5 = por %p215_p2, %p214_p1  ;;  %p221_p6 = scmp.eq.s32.totalorder %s3140_s12, 7 }
  0x11   : > { %s5333_s14 = smov (%p37_p3, %s5331_s14), 0  ;;  %s5335_s15 = smov (!%p37_p3, %s39_s15), %s4329_s9 }
  0x12   : > { %5312 = sst [smem:[#allocation12_spill]] %s5333_s14  ;;  %s198_s18 = smul.u32 %s5333_s14, %s5329_s13 }
  0x13   : > { %p4457_p7 = por %p221_p6, %p220_p4  ;;  %p41_p8 = scmp.ge.s32.totalorder %s5335_s15, 2 }
  0x14   : > { %p3143_p9 = scmp.ge.s32.totalorder %s4333_s10, 1  ;;  %s200_s20 = ssub.s32 %s197_s16, %s198_s18 }
  0x15   : > { %p269_p10 = scmp.lt.s32.totalorder %s4333_s10, 9  ;;  %s5337_s15 = smov (%p41_p8, %s5335_s15), 0 }
  0x16   : > { %5314 = sst [smem:[#allocation13_spill]] %s5337_s15  ;;  %s199_s21 = ssub.s32 %s4329_s9, %s5337_s15 }
  0x17   : > { %p270_p11 = pnand %p3143_p9, %p269_p10  ;;  %s201_s22 = sor.u32 %s200_s20, %s199_s21 }
  0x18   : > { %s204_s23 = sadd.s32 1, %s4305_s26  ;;  %p202_p12 = scmp.eq.s32.totalorder %s201_s22, 0  ;;  %v4474_v0 = vld [vmem:[%s5294_s1 + $0x20] sm:$0xff] (!%p270_p11)  ;;  %v3145_v1 = vld [vmem:[%s5294_s1 + $0x8] sm:$0xff] (!%p270_p11)  ;;  %vm355_vm0 = vcmask (!%p270_p11), 64512   ;;  %v3258_v10 = vld [vmem:[%s5294_s1 + $0x30] sm:$0xff] (!%p270_p11) }
  0x19   : > { %273 = sbr.rel (%p270_p11) target bundleno = 1050 (0x41a), region = 48  ;;  %s5304_s16 = sand.u32 (!%p270_p11), 1, %s4301_s25   ;;  %v3239_v2 = vld [vmem:[%s5294_s1 + $0x28] sm:$0xff] (!%p270_p11)  ;;  %3646 = vmatprep.subr.mxu0 (!%p270_p11), %v4474_v0  ;;  %3530 = vmatprep.subr.mxu1 (!%p270_p11), %v3145_v1  ;;  %v334_v3 = vld [vmem:[%s5294_s1] sm:$0xff] (!%p270_p11)  ;;  %v4517_v11 = vld [vmem:[%s5294_s1 + $0x10] sm:$0xff] (!%p270_p11) }
  0x1a   : > { %s4469_s11 = scalar_select %p202_p12, %s4305_s26, %s204_s23  }
  0x1b   : > { %p305_p13 = scmp.lt.s32.totalorder (!%p270_p11), %s4317_s29, 1  ;;  %s4487_s14 = smul.u32 (!%p270_p11), 144, %s5304_s16  ;;  %3647 = vmatpush3.msra.mxu0 (!%p270_p11), %v4474_v0  ;;  %3531 = vmatpush3.msra.mxu1 (!%p270_p11), %v3145_v1  ;;  %v4563_v32 = vld [vmem:[%s5294_s1 + $0x38] sm:$0xff] (!%p270_p11) }
  0x1c   : > { %p307_p0 = scmp.lt.s32.totalorder (!%p270_p11), %s4309_s27, 1  ;;  %3675 = vmatprep.subr.mxu0 (!%p270_p11), %v3239_v2  ;;  %3559 = vmatprep.subr.mxu1 (!%p270_p11), %v334_v3  ;;  %s5315_s0 = sld [smem:[#allocation14_spill]] (!%p270_p11)  ;;  %v4627_v49 = vld [vmem:[%s5294_s1 + $0x18] sm:$0xff] (!%p270_p11) }
  0x1d   : > { %p2503_p1 = scmp.eq.s32.totalorder (!%p270_p11), %s4313_s28, 0  ;;  %p2504_p2 = scmp.eq.s32.totalorder (!%p270_p11), %s4309_s27, 0 }
  0x1f   : > { %p4886_p3 = pnand (!%p270_p11), %p2504_p2, %p2503_p1 }
  0x20   : > { %s306_s15 = scalar_select %p305_p13, %s4317_s29, 1 }
  0x21   : > { %s308_s12 = scalar_select %p307_p0, %s4309_s27, 1 }
  0x22   : > { %s4052_s18 = smul.u32 50, %s306_s15 }
  0x23   : > { %s4051_s20 = smul.u32 25, %s308_s12 }
  0x25   : > { %s311_s21 = sadd.s32 %s4052_s18, %s4051_s20 }
  0x26   : > { %s3144_s13 = sshll.u32 %s311_s21, 3 }
  0x27   : > { %s4499_s8 = scalar_lea.vmem %s5315_s0, %s3144_s13 }
  0x28   : > { %v335_v4 = vld [vmem:[%s4499_s8 + $0x1] sm:$0xff]  ;;  %v1268_v5 = vld [vmem:[%s4499_s8 + $0x13] sm:$0xff]  ;;  %v336_v6 = vld [vmem:[%s4499_s8 + $0x9] sm:$0xff] }
  0x29   : > { %3532 = vmatprep.mubr.msk.f32.mxu1 %vm355_vm0, %v335_v4  ;;  %3648 = vmatprep.mubr.msk.f32.mxu0 %vm355_vm0, %v1268_v5  ;;  %v1269_v7 = vld [vmem:[%s4499_s8 + $0x1b] sm:$0xff]  ;;  %v337_v8 = vld [vmem:[%s4499_s8 + $0x11] sm:$0xff]  ;;  %v1270_v9 = vld [vmem:[%s4499_s8 + $0x23] sm:$0xff] }
  0x2a   : > { %3533 = vmatmul.mubr.msk.f32.vlgmr.msra.gmra.mrb[0].mxu1 %vm355_vm0, %v336_v6  ;;  %3649 = vmatmul.mubr.msk.f32.vlgmr.msra.gmra.mrb[0].mxu0 %vm355_vm0, %v1269_v7  ;;  %v338_v12 = vld [vmem:[%s4499_s8 + $0x19] sm:$0xff]  ;;  %v1271_v13 = vld [vmem:[%s4499_s8 + $0x2b] sm:$0xff]  ;;  %v339_v14 = vld [vmem:[%s4499_s8 + $0x21] sm:$0xff] }
  0x2b   : > { %3676 = vmatpush3.msra.mxu0 %v3239_v2  ;;  %3535 = vmatprep.mubr.msk.f32.mxu1 %vm355_vm0, %v337_v8  ;;  %v1272_v15 = vld [vmem:[%s4499_s8 + $0x33] sm:$0xff]  ;;  %v340_v16 = vld [vmem:[%s4499_s8 + $0x29] sm:$0xff]  ;;  %v1273_v17 = vld [vmem:[%s4499_s8 + $0x3b] sm:$0xff] }
  0x2c   : > { %3651 = vmatprep.mubr.msk.f32.mxu0 %vm355_vm0, %v1270_v9  ;;  %3560 = vmatpush3.msra.mxu1 %v334_v3  ;;  %v341_v18 = vld [vmem:[%s4499_s8 + $0x31] sm:$0xff]  ;;  %v1274_v19 = vld [vmem:[%s4499_s8 + $0x43] sm:$0xff]  ;;  %v342_v20 = vld [vmem:[%s4499_s8 + $0x39] sm:$0xff] }
  0x2d   : > { %3704 = vmatprep.subr.mxu0 %v3258_v10  ;;  %3588 = vmatprep.subr.mxu1 %v4517_v11  ;;  %v1275_v21 = vld [vmem:[%s4499_s8 + $0x4b] sm:$0xff]  ;;  %v343_v22 = vld [vmem:[%s4499_s8 + $0x41] sm:$0xff]  ;;  %v1276_v23 = vld [vmem:[%s4499_s8 + $0x53] sm:$0xff] }
  0x2e   : > { %3536 = vmatmul.mubr.msk.f32.gmra.mrb[2].mxu1 %vm355_vm0, %v338_v12  ;;  %3652 = vmatmul.mubr.msk.f32.gmra.mrb[2].mxu0 %vm355_vm0, %v1271_v13  ;;  %v344_v24 = vld [vmem:[%s4499_s8 + $0x49] sm:$0xff]  ;;  %v1277_v25 = vld [vmem:[%s4499_s8 + $0x5b] sm:$0xff]  ;;  %v345_v26 = vld [vmem:[%s4499_s8 + $0x51] sm:$0xff] }
  0x2f   : > { %3538 = vmatprep.mubr.msk.f32.mxu1 %vm355_vm0, %v339_v14  ;;  %3654 = vmatprep.mubr.msk.f32.mxu0 %vm355_vm0, %v1272_v15  ;;  %v1515_v27 = vld [vmem:[%s4499_s8 + $0x14] sm:$0xff]  ;;  %v1516_v29 = vld [vmem:[%s4499_s8 + $0x1c] sm:$0xff]  ;;  %v4558_v31 = vld [vmem:[%s4499_s8 + $0x24] sm:$0xff] }
  0x30   : > { %v346_v28 = vld [vmem:[%s4499_s8 + $0x59] sm:$0xff]  ;;  %v347_v30 = vld [vmem:[%s4499_s8 + $0x61] sm:$0xff]  ;;  %v348_v33 = vld [vmem:[%s4499_s8 + $0x69] sm:$0xff] }
  0x31   : > { %v4570_v34 = vld [vmem:[%s4499_s8 + $0x2c] sm:$0xff]  ;;  %v4576_v36 = vld [vmem:[%s4499_s8 + $0x34] sm:$0xff]  ;;  %v4587_v38 = vld [vmem:[%s4499_s8 + $0x3c] sm:$0xff] }
  0x32   : > { %3539 = vmatmul.mubr.msk.f32.gmra.mrb[4].mxu1 %vm355_vm0, %v340_v16  ;;  %3655 = vmatmul.mubr.msk.f32.gmra.mrb[4].mxu0 %vm355_vm0, %v1273_v17  ;;  %v349_v35 = vld [vmem:[%s4499_s8 + $0x71] sm:$0xff]  ;;  %v350_v37 = vld [vmem:[%s4499_s8 + $0x79] sm:$0xff]  ;;  %v351_v39 = vld [vmem:[%s4499_s8 + $0x81] sm:$0xff] }
  0x33   : > { %3541 = vmatprep.mubr.msk.f32.mxu1 %vm355_vm0, %v341_v18  ;;  %3657 = vmatprep.mubr.msk.f32.mxu0 %vm355_vm0, %v1274_v19  ;;  %v4591_v40 = vld [vmem:[%s4499_s8 + $0x44] sm:$0xff]  ;;  %v4601_v42 = vld [vmem:[%s4499_s8 + $0x4c] sm:$0xff]  ;;  %v4605_v44 = vld [vmem:[%s4499_s8 + $0x54] sm:$0xff] }
  0x34   : > { %v352_v41 = vld [vmem:[%s4499_s8 + $0x89] sm:$0xff]  ;;  %v316_v43 = vld [vmem:[%s4499_s8] sm:$0xff]  ;;  %v319_v50 = vld [vmem:[%s4499_s8 + $0x18] sm:$0xff] }
  0x35   : > { %v317_v45 = vld [vmem:[%s4499_s8 + $0x8] sm:$0xff]  ;;  %v4615_v46 = vld [vmem:[%s4499_s8 + $0x5c] sm:$0xff]  ;;  %v318_v47 = vld [vmem:[%s4499_s8 + $0x10] sm:$0xff] }
  0x36   : > { %3542 = vmatmul.mubr.msk.f32.gmra.mrb[6].mxu1 %vm355_vm0, %v342_v20  ;;  %3658 = vmatmul.mubr.msk.f32.gmra.mrb[6].mxu0 %vm355_vm0, %v1275_v21  ;;  %v4619_v48 = vld [vmem:[%s4499_s8 + $0x64] sm:$0xff]  ;;  %v1526_v51 = vld [vmem:[%s4499_s8 + $0x6c] sm:$0xff]  ;;  %v1527_v53 = vld [vmem:[%s4499_s8 + $0x74] sm:$0xff] }
  0x37   : > { %3544 = vmatprep.mubr.msk.f32.mxu1 %vm355_vm0, %v343_v22  ;;  %3660 = vmatprep.mubr.msk.f32.mxu0 %vm355_vm0, %v1276_v23  ;;  %v320_v52 = vld [vmem:[%s4499_s8 + $0x20] sm:$0xff]  ;;  %v321_v54 = vld [vmem:[%s4499_s8 + $0x28] sm:$0xff]  ;;  %v322_v56 = vld [vmem:[%s4499_s8 + $0x30] sm:$0xff] }
  0x38   : > { %v1528_v55 = vld [vmem:[%s4499_s8 + $0x7c] sm:$0xff]  ;;  %v1529_v57 = vld [vmem:[%s4499_s8 + $0x84] sm:$0xff]  ;;  %v1530_v59 = vld [vmem:[%s4499_s8 + $0x8c] sm:$0xff] }
  0x39   : > { %v323_v58 = vld [vmem:[%s4499_s8 + $0x38] sm:$0xff]  ;;  %v324_v60 = vld [vmem:[%s4499_s8 + $0x40] sm:$0xff]  ;;  %v325_v62 = vld [vmem:[%s4499_s8 + $0x48] sm:$0xff] }
  0x3a   : > { %3545 = vmatmul.mubr.msk.f32.gmra.mrb[8].mxu1 %vm355_vm0, %v344_v24  ;;  %3661 = vmatmul.mubr.msk.f32.gmra.mrb[8].mxu0 %vm355_vm0, %v1277_v25  ;;  %v1531_v61 = vld [vmem:[%s4499_s8 + $0x94] sm:$0xff]  ;;  %v1532_v63 = vld [vmem:[%s4499_s8 + $0x9c] sm:$0xff]  ;;  %v329_v5 = vld [vmem:[%s4499_s8 + $0x68] sm:$0xff] }
  0x3b   : > { %3547 = vmatprep.mubr.msk.f32.mxu1 %vm355_vm0, %v345_v26  ;;  %3677 = vmatprep.mubr.msk.f32.mxu0 %vm355_vm0, %v1515_v27  ;;  %v326_v1 = vld [vmem:[%s4499_s8 + $0x50] sm:$0xff]  ;;  %v327_v2 = vld [vmem:[%s4499_s8 + $0x58] sm:$0xff]  ;;  %v328_v3 = vld [vmem:[%s4499_s8 + $0x60] sm:$0xff] }
  0x3c   : > { %v4671_v4 = vld [vmem:[%s5294_s1 + $0x40] sm:$0xff]  ;;  %v330_v6 = vld [vmem:[%s4499_s8 + $0x70] sm:$0xff]  ;;  %v331_v7 = vld [vmem:[%s4499_s8 + $0x78] sm:$0xff] }
  0x3d   : > { %v332_v8 = vld [vmem:[%s4499_s8 + $0x80] sm:$0xff]  ;;  %v333_v9 = vld [vmem:[%s4499_s8 + $0x88] sm:$0xff]  ;;  %v4707_v12 = vld [vmem:[%s4499_s8 + $0x12] sm:$0xff] }
  0x3e   : > { %3548 = vmatmul.mubr.msk.f32.gmra.mrb[10].mxu1 %vm355_vm0, %v346_v28  ;;  %3678 = vmatmul.mubr.msk.f32.vlgmr.msra.gmra.mrb[0].mxu0 %vm355_vm0, %v1516_v29  ;;  %v4715_v13 = vld [vmem:[%s4499_s8 + $0x1a] sm:$0xff]  ;;  %v4719_v14 = vld [vmem:[%s4499_s8 + $0x22] sm:$0xff]  ;;  %v779_v15 = vld [vmem:[%s4499_s8 + $0x2a] sm:$0xff] }
  0x3f   : > { %3705 = vmatpush3.msra.mxu0 %v3258_v10  ;;  %3550 = vmatprep.mubr.msk.f32.mxu1 %vm355_vm0, %v347_v30  ;;  %v774_v10 = vld [vmem:[%s4499_s8 + $0x2] sm:$0xff]  ;;  %v4730_v16 = vld [vmem:[%s4499_s8 + $0x32] sm:$0xff]  ;;  %v781_v17 = vld [vmem:[%s4499_s8 + $0x3a] sm:$0xff] }
  0x40   : > { %3680 = vmatprep.mubr.msk.f32.mxu0 %vm355_vm0, %v4558_v31  ;;  %3733 = vmatprep.subr.mxu0 %v4563_v32  ;;  %v4739_v18 = vld [vmem:[%s4499_s8 + $0x42] sm:$0xff]  ;;  %v783_v20 = vld [vmem:[%s4499_s8 + $0x4a] sm:$0xff]  ;;  %v784_v22 = vld [vmem:[%s4499_s8 + $0x52] sm:$0xff] }
  0x41   : > { %v1778_v19 = vld [vmem:[%s4499_s8 + $0xa4] sm:$0xff]  ;;  %v1779_v21 = vld [vmem:[%s4499_s8 + $0xac] sm:$0xff]  ;;  %v785_v24 = vld [vmem:[%s4499_s8 + $0x5a] sm:$0xff] }
  0x42   : > { %3551 = vmatmul.mubr.msk.f32.gmra.mrb[12].mxu1 %vm355_vm0, %v348_v33  ;;  %3681 = vmatmul.mubr.msk.f32.gmra.mrb[2].mxu0 %vm355_vm0, %v4570_v34  ;;  %v2009_v23 = vld [vmem:[%s4499_s8 + $0x25] sm:$0xff]  ;;  %v2010_v25 = vld [vmem:[%s4499_s8 + $0x2d] sm:$0xff]  ;;  %v2011_v27 = vld [vmem:[%s4499_s8 + $0x35] sm:$0xff] }
  0x43   : > { %3553 = vmatprep.mubr.msk.f32.mxu1 %vm355_vm0, %v349_v35  ;;  %3683 = vmatprep.mubr.msk.f32.mxu0 %vm355_vm0, %v4576_v36  ;;  %v786_v26 = vld [vmem:[%s4499_s8 + $0x62] sm:$0xff]  ;;  %v787_v28 = vld [vmem:[%s4499_s8 + $0x6a] sm:$0xff]  ;;  %v788_v30 = vld [vmem:[%s4499_s8 + $0x72] sm:$0xff] }
  0x44   : > { %v2012_v29 = vld [vmem:[%s4499_s8 + $0x3d] sm:$0xff]  ;;  %v2014_v33 = vld [vmem:[%s4499_s8 + $0x4d] sm:$0xff]  ;;  %v2015_v35 = vld [vmem:[%s4499_s8 + $0x55] sm:$0xff] }
  0x46   : > { %3554 = vmatmul.mubr.msk.f32.gmra.mrb[14].mxu1 %vm355_vm0, %v350_v37  ;;  %3684 = vmatmul.mubr.msk.f32.gmra.mrb[4].mxu0 %vm355_vm0, %v4587_v38  ;;  %v2016_v37 = vld [vmem:[%s4499_s8 + $0x5d] sm:$0xff] }
  0x47   : > { %3556 = vmatprep.mubr.msk.f32.mxu1 %vm355_vm0, %v351_v39  ;;  %3686 = vmatprep.mubr.msk.f32.mxu0 %vm355_vm0, %v4591_v40  ;;  %v2018_v39 = vld [vmem:[%s4499_s8 + $0x6d] sm:$0xff] }
  0x4a   : > { %3557 = vmatmul.mubr.msk.f32.gmra.mrb[16].mxu1 %vm355_vm0, %v352_v41  ;;  %3687 = vmatmul.mubr.msk.f32.gmra.mrb[6].mxu0 %vm355_vm0, %v4601_v42  ;;  %v2020_v41 = vld [vmem:[%s4499_s8 + $0x7d] sm:$0xff] }
  0x4b   : > { %3561 = vmatprep.mubr.msk.f32.mxu1 %vm355_vm0, %v316_v43  ;;  %3689 = vmatprep.mubr.msk.f32.mxu0 %vm355_vm0, %v4605_v44  ;;  %v2022_v43 = vld [vmem:[%s4499_s8 + $0x8d] sm:$0xff] }
  0x4e   : > { %3562 = vmatmul.mubr.msk.f32.vlgmr.msra.gmra.mrb[0].mxu1 %vm355_vm0, %v317_v45  ;;  %3690 = vmatmul.mubr.msk.f32.gmra.mrb[8].mxu0 %vm355_vm0, %v4615_v46  ;;  %v2025_v45 = vld [vmem:[%s4499_s8 + $0xa5] sm:$0xff] }
  0x4f   : > { %3564 = vmatprep.mubr.msk.f32.mxu1 %vm355_vm0, %v318_v47  ;;  %3692 = vmatprep.mubr.msk.f32.mxu0 %vm355_vm0, %v4619_v48  ;;  %v2256_v47 = vld [vmem:[%s4499_s8 + $0x26] sm:$0xff] }
  0x50   : > { %3589 = vmatpush3.msra.mxu1 %v4517_v11  ;;  %v775_v11 = vld [vmem:[%s4499_s8 + $0xa] sm:$0xff] }
  0x51   : > { %3617 = vmatprep.subr.mxu1 %v4627_v49 }
  0x52   : > { %3565 = vmatmul.mubr.msk.f32.gmra.mrb[2].mxu1 %vm355_vm0, %v319_v50  ;;  %3693 = vmatmul.mubr.msk.f32.gmra.mrb[10].mxu0 %vm355_vm0, %v1526_v51  ;;  %v2259_v50 = vld [vmem:[%s4499_s8 + $0x3e] sm:$0xff] }
  0x53   : > { %3567 = vmatprep.mubr.msk.f32.mxu1 %vm355_vm0, %v320_v52  ;;  %3695 = vmatprep.mubr.msk.f32.mxu0 %vm355_vm0, %v1527_v53  ;;  %v2261_v52 = vld [vmem:[%s4499_s8 + $0x4e] sm:$0xff] }
  0x56   : > { %3568 = vmatmul.mubr.msk.f32.gmra.mrb[4].mxu1 %vm355_vm0, %v321_v54  ;;  %3696 = vmatmul.mubr.msk.f32.gmra.mrb[12].mxu0 %vm355_vm0, %v1528_v55  ;;  %v2262_v54 = vld [vmem:[%s4499_s8 + $0x56] sm:$0xff] }
  0x57   : > { %3570 = vmatprep.mubr.msk.f32.mxu1 %vm355_vm0, %v322_v56  ;;  %3698 = vmatprep.mubr.msk.f32.mxu0 %vm355_vm0, %v1529_v57  ;;  %v2263_v56 = vld [vmem:[%s4499_s8 + $0x5e] sm:$0xff] }
  0x5a   : > { %3571 = vmatmul.mubr.msk.f32.gmra.mrb[6].mxu1 %vm355_vm0, %v323_v58  ;;  %3699 = vmatmul.mubr.msk.f32.gmra.mrb[14].mxu0 %vm355_vm0, %v1530_v59  ;;  %v2264_v58 = vld [vmem:[%s4499_s8 + $0x66] sm:$0xff] }
  0x5b   : > { %3573 = vmatprep.mubr.msk.f32.mxu1 %vm355_vm0, %v324_v60  ;;  %3701 = vmatprep.mubr.msk.f32.mxu0 %vm355_vm0, %v1531_v61  ;;  %v2265_v60 = vld [vmem:[%s4499_s8 + $0x6e] sm:$0xff] }
  0x5e   : > { %3574 = vmatmul.mubr.msk.f32.gmra.mrb[8].mxu1 %vm355_vm0, %v325_v62  ;;  %3702 = vmatmul.mubr.msk.f32.gmra.mrb[16].mxu0 %vm355_vm0, %v1532_v63  ;;  %v2266_v62 = vld [vmem:[%s4499_s8 + $0x76] sm:$0xff] }
  0x5f   : > { %3576 = vmatprep.mubr.msk.f32.mxu1 %vm355_vm0, %v326_v1  ;;  %3706 = vmatprep.mubr.msk.f32.mxu0 %vm355_vm0, %v4558_v31  ;;  %v2013_v31 = vld [vmem:[%s4499_s8 + $0x45] sm:$0xff] }
  0x60   : > { %v2267_v1 = vld [vmem:[%s4499_s8 + $0x7e] sm:$0xff] }
  0x62   : > { %3577 = vmatmul.mubr.msk.f32.gmra.mrb[10].mxu1 %vm355_vm0, %v327_v2  ;;  %3707 = vmatmul.mubr.msk.f32.vlgmr.msra.gmra.mrb[0].mxu0 %vm355_vm0, %v4570_v34  ;;  %v790_v34 = vld [vmem:[%s4499_s8 + $0x82] sm:$0xff] }
  0x63   : > { %3734 = vmatpush3.msra.mxu0 %v4563_v32  ;;  %3579 = vmatprep.mubr.msk.f32.mxu1 %vm355_vm0, %v328_v3  ;;  %v789_v32 = vld [vmem:[%s4499_s8 + $0x7a] sm:$0xff]  ;;  %v1282_v2 = vld [vmem:[%s4499_s8 + $0x83] sm:$0xff] }
  0x64   : > { %3709 = vmatprep.mubr.msk.f32.mxu0 %vm355_vm0, %v4576_v36  ;;  %3762 = vmatprep.subr.mxu0 %v4671_v4  ;;  %v791_v36 = vld [vmem:[%s4499_s8 + $0x8a] sm:$0xff] }
  0x65   : > { %v2268_v3 = vld [vmem:[%s4499_s8 + $0x86] sm:$0xff] }
  0x66   : > { %3580 = vmatmul.mubr.msk.f32.gmra.mrb[12].mxu1 %vm355_vm0, %v329_v5  ;;  %3710 = vmatmul.mubr.msk.f32.gmra.mrb[2].mxu0 %vm355_vm0, %v4587_v38  ;;  %v2017_v38 = vld [vmem:[%s4499_s8 + $0x65] sm:$0xff]  ;;  %v2269_v5 = vld [vmem:[%s4499_s8 + $0x8e] sm:$0xff] }
  0x67   : > { %3582 = vmatprep.mubr.msk.f32.mxu1 %vm355_vm0, %v330_v6  ;;  %3712 = vmatprep.mubr.msk.f32.mxu0 %vm355_vm0, %v4591_v40  ;;  %v2019_v40 = vld [vmem:[%s4499_s8 + $0x75] sm:$0xff] }
  0x68   : > { %v1284_v6 = vld [vmem:[%s4499_s8 + $0x93] sm:$0xff] }
  0x6a   : > { %3583 = vmatmul.mubr.msk.f32.gmra.mrb[14].mxu1 %vm355_vm0, %v331_v7  ;;  %3713 = vmatmul.mubr.msk.f32.gmra.mrb[4].mxu0 %vm355_vm0, %v4601_v42  ;;  %v2021_v42 = vld [vmem:[%s4499_s8 + $0x85] sm:$0xff]  ;;  %v2270_v7 = vld [vmem:[%s4499_s8 + $0x96] sm:$0xff] }
  0x6b   : > { %3585 = vmatprep.mubr.msk.f32.mxu1 %vm355_vm0, %v332_v8  ;;  %3715 = vmatprep.mubr.msk.f32.mxu0 %vm355_vm0, %v4605_v44  ;;  %v2023_v44 = vld [vmem:[%s4499_s8 + $0x95] sm:$0xff] }
  0x6c   : > { %v1285_v8 = vld [vmem:[%s4499_s8 + $0x9b] sm:$0xff] }
  0x6e   : > { %3586 = vmatmul.mubr.msk.f32.gmra.mrb[16].mxu1 %vm355_vm0, %v333_v9  ;;  %3716 = vmatmul.mubr.msk.f32.gmra.mrb[6].mxu0 %vm355_vm0, %v4615_v46  ;;  %v2026_v46 = vld [vmem:[%s4499_s8 + $0xad] sm:$0xff]  ;;  %v2271_v9 = vld [vmem:[%s4499_s8 + $0x9e] sm:$0xff] }
  0x6f   : > { %3590 = vmatprep.mubr.msk.f32.mxu1 %vm355_vm0, %v774_v10  ;;  %3718 = vmatprep.mubr.msk.f32.mxu0 %vm355_vm0, %v4619_v48  ;;  %v2257_v48 = vld [vmem:[%s4499_s8 + $0x2e] sm:$0xff]  ;;  %v2272_v10 = vld [vmem:[%s4499_s8 + $0xa6] sm:$0xff] }
  0x72   : > { %3591 = vmatmul.mubr.msk.f32.vlgmr.msra.gmra.mrb[0].mxu1 %vm355_vm0, %v775_v11  ;;  %3719 = vmatmul.mubr.msk.f32.gmra.mrb[8].mxu0 %vm355_vm0, %v1526_v51  ;;  %v2260_v51 = vld [vmem:[%s4499_s8 + $0x46] sm:$0xff]  ;;  %v2273_v11 = vld [vmem:[%s4499_s8 + $0xae] sm:$0xff] }
  0x73   : > { %3593 = vmatprep.mubr.msk.f32.mxu1 %vm355_vm0, %v4707_v12  ;;  %3721 = vmatprep.mubr.msk.f32.mxu0 %vm355_vm0, %v1527_v53  ;;  %v1037_v53 = vld [vmem:[%s4499_s8 + $0x92] sm:$0xff] }
  0x74   : > { %3618 = vmatpush3.msra.mxu1 %v4627_v49  ;;  %v2258_v49 = vld [vmem:[%s4499_s8 + $0x36] sm:$0xff] }
  0x75   : > { %3904 = vmatprep.subr.mxu1 %v4474_v0 }
  0x76   : > { %3594 = vmatmul.mubr.msk.f32.gmra.mrb[2].mxu1 %vm355_vm0, %v4715_v13  ;;  %3722 = vmatmul.mubr.msk.f32.gmra.mrb[10].mxu0 %vm355_vm0, %v1528_v55  ;;  %v1038_v55 = vld [vmem:[%s4499_s8 + $0x9a] sm:$0xff] }
  0x77   : > { %3596 = vmatprep.mubr.msk.f32.mxu1 %vm355_vm0, %v4719_v14  ;;  %3724 = vmatprep.mubr.msk.f32.mxu0 %vm355_vm0, %v1529_v57  ;;  %v1278_v57 = vld [vmem:[%s4499_s8 + $0x63] sm:$0xff] }
  0x7a   : > { %3597 = vmatmul.mubr.msk.f32.gmra.mrb[4].mxu1 %vm355_vm0, %v779_v15  ;;  %3725 = vmatmul.mubr.msk.f32.gmra.mrb[12].mxu0 %vm355_vm0, %v1530_v59  ;;  %v1279_v59 = vld [vmem:[%s4499_s8 + $0x6b] sm:$0xff] }
  0x7b   : > { %3599 = vmatprep.mubr.msk.f32.mxu1 %vm355_vm0, %v4730_v16  ;;  %3727 = vmatprep.mubr.msk.f32.mxu0 %vm355_vm0, %v1531_v61  ;;  %v1280_v61 = vld [vmem:[%s4499_s8 + $0x73] sm:$0xff] }
  0x7e   : > { %3600 = vmatmul.mubr.msk.f32.gmra.mrb[6].mxu1 %vm355_vm0, %v781_v17  ;;  %3728 = vmatmul.mubr.msk.f32.gmra.mrb[14].mxu0 %vm355_vm0, %v1532_v63  ;;  %v1281_v63 = vld [vmem:[%s4499_s8 + $0x7b] sm:$0xff] }
  0x7f   : > { %3602 = vmatprep.mubr.msk.f32.mxu1 %vm355_vm0, %v4739_v18  ;;  %3730 = vmatprep.mubr.msk.f32.mxu0 %vm355_vm0, %v1778_v19 }
  0x82   : > { %3603 = vmatmul.mubr.msk.f32.gmra.mrb[8].mxu1 %vm355_vm0, %v783_v20  ;;  %3731 = vmatmul.mubr.msk.f32.gmra.mrb[16].mxu0 %vm355_vm0, %v1779_v21 }
  0x83   : > { %3605 = vmatprep.mubr.msk.f32.mxu1 %vm355_vm0, %v784_v22  ;;  %3735 = vmatprep.mubr.msk.f32.mxu0 %vm355_vm0, %v2009_v23 }
  0x86   : > { %3606 = vmatmul.mubr.msk.f32.gmra.mrb[10].mxu1 %vm355_vm0, %v785_v24  ;;  %3736 = vmatmul.mubr.msk.f32.vlgmr.msra.gmra.mrb[0].mxu0 %vm355_vm0, %v2010_v25 }
  0x87   : > { %3763 = vmatpush3.msra.mxu0 %v4671_v4  ;;  %3608 = vmatprep.mubr.msk.f32.mxu1 %vm355_vm0, %v786_v26  ;;  %v1283_v4 = vld [vmem:[%s4499_s8 + $0x8b] sm:$0xff] }
  0x88   : > { %3738 = vmatprep.mubr.msk.f32.mxu0 %vm355_vm0, %v2011_v27 }
  0x8a   : > { %3609 = vmatmul.mubr.msk.f32.gmra.mrb[12].mxu1 %vm355_vm0, %v787_v28  ;;  %3739 = vmatmul.mubr.msk.f32.gmra.mrb[2].mxu0 %vm355_vm0, %v2012_v29 }
  0x8b   : > { %3611 = vmatprep.mubr.msk.f32.mxu1 %vm355_vm0, %v788_v30  ;;  %3741 = vmatprep.mubr.msk.f32.mxu0 %vm355_vm0, %v2013_v31 }
  0x8e   : > { %3612 = vmatmul.mubr.msk.f32.gmra.mrb[14].mxu1 %vm355_vm0, %v789_v32  ;;  %3742 = vmatmul.mubr.msk.f32.gmra.mrb[4].mxu0 %vm355_vm0, %v2014_v33 }
  0x8f   : > { %3614 = vmatprep.mubr.msk.f32.mxu1 %vm355_vm0, %v790_v34  ;;  %3744 = vmatprep.mubr.msk.f32.mxu0 %vm355_vm0, %v2015_v35 }
  0x92   : > { %3615 = vmatmul.mubr.msk.f32.gmra.mrb[16].mxu1 %vm355_vm0, %v791_v36  ;;  %3745 = vmatmul.mubr.msk.f32.gmra.mrb[6].mxu0 %vm355_vm0, %v2016_v37 }
  0x93   : > { %3619 = vmatprep.mubr.msk.f32.mxu1 %vm355_vm0, %v4707_v12  ;;  %3747 = vmatprep.mubr.msk.f32.mxu0 %vm355_vm0, %v2017_v38 }
  0x96   : > { %3620 = vmatmul.mubr.msk.f32.vlgmr.msra.gmra.mrb[0].mxu1 %vm355_vm0, %v4715_v13  ;;  %3748 = vmatmul.mubr.msk.f32.gmra.mrb[8].mxu0 %vm355_vm0, %v2018_v39 }
  0x97   : > { %3622 = vmatprep.mubr.msk.f32.mxu1 %vm355_vm0, %v4719_v14  ;;  %3750 = vmatprep.mubr.msk.f32.mxu0 %vm355_vm0, %v2019_v40 }
  0x98   : > { %3905 = vmatpush3.msra.mxu1 %v4474_v0  ;;  %v2024_v0 = vld [vmem:[%s4499_s8 + $0x9d] sm:$0xff]  ;;  %s4927_s8 = scalar_lea.vmem [#allocation6], %s4487_s14 }
  0x9a   : > { %3623 = vmatmul.mubr.msk.f32.gmra.mrb[2].mxu1 %vm355_vm0, %v779_v15  ;;  %3751 = vmatmul.mubr.msk.f32.gmra.mrb[10].mxu0 %vm355_vm0, %v2020_v41 }
  0x9b   : > { %3625 = vmatprep.mubr.msk.f32.mxu1 %vm355_vm0, %v4730_v16  ;;  %3753 = vmatprep.mubr.msk.f32.mxu0 %vm355_vm0, %v2021_v42 }
  0x9e   : > { %3626 = vmatmul.mubr.msk.f32.gmra.mrb[4].mxu1 %vm355_vm0, %v781_v17  ;;  %3754 = vmatmul.mubr.msk.f32.gmra.mrb[12].mxu0 %vm355_vm0, %v2022_v43 }
  0x9f   : > { %3628 = vmatprep.mubr.msk.f32.mxu1 %vm355_vm0, %v4739_v18  ;;  %3756 = vmatprep.mubr.msk.f32.mxu0 %vm355_vm0, %v2023_v44 }
  0xa2   : > { %3629 = vmatmul.mubr.msk.f32.gmra.mrb[6].mxu1 %vm355_vm0, %v783_v20  ;;  %3757 = vmatmul.mubr.msk.f32.gmra.mrb[14].mxu0 %vm355_vm0, %v2024_v0 }
  0xa3   : > { %3631 = vmatprep.mubr.msk.f32.mxu1 %vm355_vm0, %v784_v22  ;;  %3759 = vmatprep.mubr.msk.f32.mxu0 %vm355_vm0, %v2025_v45 }
  0xa6   : > { %3632 = vmatmul.mubr.msk.f32.gmra.mrb[8].mxu1 %vm355_vm0, %v785_v24  ;;  %3760 = vmatmul.mubr.msk.f32.gmra.mrb[16].mxu0 %vm355_vm0, %v2026_v46 }
  0xa7   : > { %3634 = vmatprep.mubr.msk.f32.mxu1 %vm355_vm0, %v786_v26  ;;  %3764 = vmatprep.mubr.msk.f32.mxu0 %vm355_vm0, %v2256_v47 }
  0xaa   : > { %3635 = vmatmul.mubr.msk.f32.gmra.mrb[10].mxu1 %vm355_vm0, %v787_v28  ;;  %3765 = vmatmul.mubr.msk.f32.vlgmr.msra.gmra.mrb[0].mxu0 %vm355_vm0, %v2257_v48 }
  0xab   : > { %3637 = vmatprep.mubr.msk.f32.mxu1 %vm355_vm0, %v788_v30  ;;  %3767 = vmatprep.mubr.msk.f32.mxu0 %vm355_vm0, %v2258_v49 }
  0xae   : > { %3638 = vmatmul.mubr.msk.f32.gmra.mrb[12].mxu1 %vm355_vm0, %v789_v32  ;;  %3768 = vmatmul.mubr.msk.f32.gmra.mrb[2].mxu0 %vm355_vm0, %v2259_v50 }
  0xaf   : > { %3640 = vmatprep.mubr.msk.f32.mxu1 %vm355_vm0, %v790_v34  ;;  %3770 = vmatprep.mubr.msk.f32.mxu0 %vm355_vm0, %v2260_v51 }
  0xb2   : > { %3641 = vmatmul.mubr.msk.f32.gmra.mrb[14].mxu1 %vm355_vm0, %v791_v36  ;;  %3771 = vmatmul.mubr.msk.f32.gmra.mrb[4].mxu0 %vm355_vm0, %v2261_v52 }
  0xb3   : > { %3643 = vmatprep.mubr.msk.f32.mxu1 %vm355_vm0, %v1037_v53  ;;  %3773 = vmatprep.mubr.msk.f32.mxu0 %vm355_vm0, %v2262_v54 }
  0xb6   : > { %3644 = vmatmul.mubr.msk.f32.gmra.mrb[16].mxu1 %vm355_vm0, %v1038_v55  ;;  %3774 = vmatmul.mubr.msk.f32.gmra.mrb[6].mxu0 %vm355_vm0, %v2263_v56 }
  0xb7   : > { %3663 = vmatprep.mubr.msk.f32.mxu1 %vm355_vm0, %v1278_v57  ;;  %3776 = vmatprep.mubr.msk.f32.mxu0 %vm355_vm0, %v2264_v58 }
  0xba   : > { %3664 = vmatmul.mubr.msk.f32.vlgmr.msra.gmra.mrb[10].mxu1 %vm355_vm0, %v1279_v59  ;;  %3777 = vmatmul.mubr.msk.f32.gmra.mrb[8].mxu0 %vm355_vm0, %v2265_v60 }
  0xbb   : > { %3666 = vmatprep.mubr.msk.f32.mxu1 %vm355_vm0, %v1280_v61  ;;  %3779 = vmatprep.mubr.msk.f32.mxu0 %vm355_vm0, %v2266_v62 }
  0xbe   : > { %3667 = vmatmul.mubr.msk.f32.gmra.mrb[12].mxu1 %vm355_vm0, %v1281_v63  ;;  %3780 = vmatmul.mubr.msk.f32.gmra.mrb[10].mxu0 %vm355_vm0, %v2267_v1 }
  0xbf   : > { %3669 = vmatprep.mubr.msk.f32.mxu1 %vm355_vm0, %v1282_v2  ;;  %3782 = vmatprep.mubr.msk.f32.mxu0 %vm355_vm0, %v2268_v3  ;;  %v4335_v2 = vmov (!%p4886_p3), 0.0  }
  0xc0   : > { %2509 = vst [vmem:[#allocation2] sm:$0x1] (!%p4886_p3), %v4335_v2  ;;  %2510 = vst [vmem:[#allocation3] sm:$0x1] (!%p4886_p3), %v4335_v2 }
  0xc2   : > { %3670 = vmatmul.mubr.msk.f32.gmra.mrb[14].mxu1 %vm355_vm0, %v1283_v4  ;;  %3783 = vmatmul.mubr.msk.f32.gmra.mrb[12].mxu0 %vm355_vm0, %v2269_v5 }
  0xc3   : > { %3672 = vmatprep.mubr.msk.f32.mxu1 %vm355_vm0, %v1284_v6  ;;  %3785 = vmatprep.mubr.msk.f32.mxu0 %vm355_vm0, %v2270_v7 }
  0xc6   : > { %3673 = vmatmul.mubr.msk.f32.gmra.mrb[16].mxu1 %vm355_vm0, %v1285_v8  ;;  %3786 = vmatmul.mubr.msk.f32.gmra.mrb[14].mxu0 %vm355_vm0, %v2271_v9 }
  0xc7   : > { %3788 = vmatprep.mubr.msk.f32.mxu0 %vm355_vm0, %v2272_v10 }
  0xca   : > { %3789 = vmatmul.mubr.msk.f32.gmra.mrb[16].mxu0 %vm355_vm0, %v2273_v11 }
 0x169   : > { %v3621_v12 = vpop.f32.mrb[0].mxu1 }
 0x16a   : > { %v1161_v13 = vpop.f32.mrb[1].mxu1 }
 0x16d   : > { %v3624_v14 = vpop.f32.mrb[2].mxu1 }
 0x16e   : > { %v1171_v15 = vpop.f32.mrb[3].mxu1 }
 0x171   : > { %v3627_v16 = vpop.f32.mrb[4].mxu1 }
 0x172   : > { %v1181_v17 = vpop.f32.mrb[5].mxu1 }
 0x175   : > { %v3630_v18 = vpop.f32.mrb[6].mxu1 }
 0x176   : > { %v1191_v19 = vpop.f32.mrb[7].mxu1 }
 0x179   : > { %v3633_v20 = vpop.f32.mrb[8].mxu1 }
 0x17a   : > { %v1201_v21 = vpop.f32.mrb[9].mxu1 }
 0x17d   : > { %v3766_v22 = vpop.f32.mrb[0].mxu0 }
 0x17e   : > { %v4890_v23 = vadd.f32 %v3766_v22, %v3621_v12  ;;  %v2396_v24 = vpop.f32.mrb[1].mxu0 }
 0x17f   : > { %v4892_v25 = vadd.f32 %v2396_v24, %v1161_v13 }
 0x181   : > { %v3769_v26 = vpop.f32.mrb[2].mxu0 }
 0x182   : > { %v4894_v27 = vadd.f32 %v3769_v26, %v3624_v14  ;;  %v2406_v28 = vpop.f32.mrb[3].mxu0 }
 0x183   : > { %v4896_v29 = vadd.f32 %v2406_v28, %v1171_v15 }
 0x185   : > { %v3772_v30 = vpop.f32.mrb[4].mxu0 }
 0x186   : > { %v4898_v31 = vadd.f32 %v3772_v30, %v3627_v16  ;;  %v2416_v32 = vpop.f32.mrb[5].mxu0 }
 0x187   : > { %v4900_v33 = vadd.f32 %v2416_v32, %v1181_v17 }
 0x189   : > { %v3775_v34 = vpop.f32.mrb[6].mxu0 }
 0x18a   : > { %v4902_v35 = vadd.f32 %v3775_v34, %v3630_v18  ;;  %v2426_v36 = vpop.f32.mrb[7].mxu0 }
 0x18b   : > { %v4904_v37 = vadd.f32 %v2426_v36, %v1191_v19 }
 0x18d   : > { %v3665_v38 = vpop.f32.mrb[10].mxu1  ;;  %v3778_v39 = vpop.f32.mrb[8].mxu0 }
 0x18e   : > { %v4906_v40 = vadd.f32 %v3778_v39, %v3633_v20  ;;  %v1458_v41 = vpop.f32.mrb[11].mxu1  ;;  %v2436_v42 = vpop.f32.mrb[9].mxu0 }
 0x18f   : > { %v4908_v43 = vadd.f32 %v2436_v42, %v1201_v21 }
 0x191   : > { %v3668_v44 = vpop.f32.mrb[12].mxu1  ;;  %v3781_v0 = vpop.f32.mrb[10].mxu0 }
 0x192   : > { %v4910_v45 = vadd.f32 %v3781_v0, %v3665_v38  ;;  %v1468_v46 = vpop.f32.mrb[13].mxu1  ;;  %v2446_v47 = vpop.f32.mrb[11].mxu0 }
 0x193   : > { %v4912_v48 = vadd.f32 %v2446_v47, %v1458_v41 }
 0x195   : > { %v3671_v49 = vpop.f32.mrb[14].mxu1  ;;  %v3784_v50 = vpop.f32.mrb[12].mxu0 }
 0x196   : > { %v4914_v51 = vadd.f32 %v3784_v50, %v3668_v44  ;;  %v1478_v52 = vpop.f32.mrb[15].mxu1  ;;  %v2456_v53 = vpop.f32.mrb[13].mxu0 }
 0x197   : > { %v4916_v54 = vadd.f32 %v2456_v53, %v1468_v46 }
 0x199   : > { %v3674_v55 = vpop.f32.mrb[16].mxu1  ;;  %v3787_v56 = vpop.f32.mrb[14].mxu0  ;;  %2508 = sbr.rel (%p4886_p3) target bundleno = 416 (0x1a0), region = 52 }
 0x19a   : > { %v4918_v57 = vadd.f32 %v3787_v56, %v3671_v49  ;;  %v1488_v58 = vpop.f32.mrb[17].mxu1  ;;  %v2466_v59 = vpop.f32.mrb[15].mxu0 }
 0x19b   : > { %v4920_v60 = vadd.f32 %v2466_v59, %v1478_v52 }
 0x19d   : > { %v3790_v61 = vpop.f32.mrb[16].mxu0 }
 0x19e   : > { %v4922_v62 = vadd.f32 %v3790_v61, %v3674_v55  ;;  %v2476_v63 = vpop.f32.mrb[17].mxu0 }
 0x19f   : > { %v4924_v1 = vadd.f32 %v2476_v63, %v1488_v58 }
 0x1a0 PF: > { %p3315_p4 = scmp.ne.s32.totalorder %s4313_s28, 0 }
 0x1a1   : > { %v3827_v3 = vpack.c.bf16 (!%p3315_p4), %v4890_v23, %v4892_v25  ;;  %v2602_v4 = vmul.f32 (!%p3315_p4), %v4892_v25, %v4892_v25  ;;  %v2603_v5 = vmul.f32 (!%p3315_p4), %v4890_v23, %v4890_v23  ;;  %v4336_v6 = vmov (!%p3315_p4), 0.0|0.0   ;;  %v2514_v21 = vld [vmem:[%s5299_s6] sm:$0x3] (!%p3315_p4) }
 0x1a2   : > { %2513 = sbr.rel (%p3315_p4) target bundleno = 671 (0x29f), region = 56  ;;  %3826 = vmatprep.subr.bf16.mxu0 (!%p3315_p4), %v4336_v6  ;;  %3853 = vmatprep.subr.bf16.mxu1 (!%p3315_p4), %v4336_v6  ;;  %v2604_v7 = vmul.f32 (!%p3315_p4), %v4896_v29, %v4896_v29  ;;  %v2605_v8 = vmul.f32 (!%p3315_p4), %v4894_v27, %v4894_v27  ;;  %v3830_v10 = vpack.c.bf16 (!%p3315_p4), %v4894_v27, %v4896_v29  ;;  %v2517_v14 = vlaneseq (!%p3315_p4)  ;;  %v2515_v63 = vld [vmem:[#allocation2] sm:$0x1] (!%p3315_p4) }
 0x1a3   : > { %3828 = vmatpush1.bf16.msra.mxu0 (!%p3315_p4), %v3827_v3  ;;  %v3854_v9 = vpack.c.bf16 (!%p3315_p4), %v2603_v5, %v2602_v4  ;;  %v2606_v12 = vmul.f32 (!%p3315_p4), %v4900_v33, %v4900_v33  ;;  %v2607_v13 = vmul.f32 (!%p3315_p4), %v4898_v31, %v4898_v31  ;;  %v3833_v15 = vpack.c.bf16 (!%p3315_p4), %v4898_v31, %v4900_v33  ;;  %v2601_v3 = vld [vmem:[#allocation3] sm:$0x1] (!%p3315_p4) }
 0x1a4   : > { %3829 = vmatprep.subr.bf16.mxu0 (!%p3315_p4), %v4336_v6  ;;  %v3857_v11 = vpack.c.bf16 (!%p3315_p4), %v2605_v8, %v2604_v7  ;;  %v2608_v17 = vmul.f32 (!%p3315_p4), %v4904_v37, %v4904_v37  ;;  %v2609_v18 = vmul.f32 (!%p3315_p4), %v4902_v35, %v4902_v35  ;;  %v2518_v19 = vshrl.u32 (!%p3315_p4), %v2517_v14, 7 }
 0x1a5   : > { %3855 = vmatpush1.bf16.msra.mxu1 (!%p3315_p4), %v3854_v9  ;;  %v3860_v16 = vpack.c.bf16 (!%p3315_p4), %v2607_v13, %v2606_v12  ;;  %v3836_v20 = vpack.c.bf16 (!%p3315_p4), %v4902_v35, %v4904_v37  ;;  %v2610_v26 = vmul.f32 (!%p3315_p4), %v4908_v43, %v4908_v43  ;;  %v2611_v28 = vmul.f32 (!%p3315_p4), %v4906_v40, %v4906_v40 }
 0x1a6   : > { %3856 = vmatprep.subr.bf16.mxu1 (!%p3315_p4), %v4336_v6  ;;  %v2523_v22 = vsub.s32 (!%p3315_p4), 1, %v2518_v19  ;;  %v3863_v24 = vpack.c.bf16 (!%p3315_p4), %v2609_v18, %v2608_v17  ;;  %vm2526_vm1 = vcmask (!%p3315_p4), 130048   ;;  %v3839_v32 = vpack.c.bf16 (!%p3315_p4), %v4906_v40, %v4908_v43 }
 0x1a7   : > { %3831 = vmatpush1.bf16.msra.mxu0 (!%p3315_p4), %v3830_v10  ;;  %v3866_v34 = vpack.c.bf16 (!%p3315_p4), %v2611_v28, %v2610_v26  ;;  %v2612_v36 = vmul.f32 (!%p3315_p4), %v4912_v48, %v4912_v48  ;;  %v2613_v38 = vmul.f32 (!%p3315_p4), %v4910_v45, %v4910_v45  ;;  %v3842_v39 = vpack.c.bf16 (!%p3315_p4), %v4910_v45, %v4912_v48 }
 0x1a8   : > { %3832 = vmatprep.subr.bf16.mxu0 (!%p3315_p4), %v4336_v6  ;;  %v2524_v30 = vrot.slane (!%p3315_p4), %v2514_v21, %v2523_v22  ;;  %v2614_v42 = vmul.f32 (!%p3315_p4), %v4916_v54, %v4916_v54  ;;  %v2615_v44 = vmul.f32 (!%p3315_p4), %v4914_v51, %v4914_v51  ;;  %v3845_v0 = vpack.c.bf16 (!%p3315_p4), %v4914_v51, %v4916_v54 }
 0x1a9   : > { %3858 = vmatpush1.bf16.msra.mxu1 %v3857_v11  ;;  %v3869_v41 = vpack.c.bf16 %v2613_v38, %v2612_v36  ;;  %v2616_v47 = vmul.f32 %v4920_v60, %v4920_v60  ;;  %v2617_v49 = vmul.f32 %v4918_v57, %v4918_v57  ;;  %v3848_v50 = vpack.c.bf16 %v4918_v57, %v4920_v60 }
 0x1aa   : > { %3859 = vmatprep.subr.bf16.mxu1 %v4336_v6  ;;  %3316 = vmatprep.mubr.msk.f32.mxu0 %vm2526_vm1, %v2524_v30  ;;  %v3872_v46 = vpack.c.bf16 %v2615_v44, %v2614_v42  ;;  %v2618_v53 = vmul.f32 %v4924_v1, %v4924_v1  ;;  %v2619_v55 = vmul.f32 %v4922_v62, %v4922_v62  ;;  %v2519_v56 = vsub.s32 0, %v2518_v19 }
 0x1ab   : > { %3834 = vmatpush1.bf16.msra.mxu0 %v3833_v15  ;;  %3317 = vmatprep.mubr.msk.f32.mxu1 %vm2526_vm1, %v2524_v30  ;;  %v3875_v52 = vpack.c.bf16 %v2617_v49, %v2616_v47  ;;  %v3851_v58 = vpack.c.bf16 %v4922_v62, %v4924_v1 }
 0x1ac   : > { %3835 = vmatprep.subr.bf16.mxu0 %v4336_v6  ;;  %v3878_v59 = vpack.c.bf16 %v2619_v55, %v2618_v53  ;;  %v2520_v61 = vrot.slane %v2514_v21, %v2519_v56 }
 0x1ad   : > { %3861 = vmatpush1.bf16.msra.mxu1 %v3860_v16 }
 0x1ae   : > { %3862 = vmatprep.subr.bf16.mxu1 %v4336_v6 }
 0x1af   : > { %3837 = vmatpush1.bf16.msra.mxu0 %v3836_v20 }
 0x1b0   : > { %3838 = vmatprep.subr.bf16.mxu0 %v4336_v6 }
 0x1b1   : > { %3864 = vmatpush1.bf16.msra.mxu1 %v3863_v24 }
 0x1b2   : > { %3865 = vmatprep.subr.bf16.mxu1 %v4336_v6 }
 0x1b3   : > { %3840 = vmatpush1.bf16.msra.mxu0 %v3839_v32 }
 0x1b4   : > { %3841 = vmatprep.subr.bf16.mxu0 %v4336_v6 }
 0x1b5   : > { %3867 = vmatpush1.bf16.msra.mxu1 %v3866_v34 }
 0x1b6   : > { %3868 = vmatprep.subr.bf16.mxu1 %v4336_v6 }
 0x1b7   : > { %3843 = vmatpush1.bf16.msra.mxu0 %v3842_v39 }
 0x1b8   : > { %3844 = vmatprep.subr.bf16.mxu0 %v4336_v6 }
 0x1b9   : > { %3870 = vmatpush1.bf16.msra.mxu1 %v3869_v41 }
 0x1ba   : > { %3871 = vmatprep.subr.bf16.mxu1 %v4336_v6 }
 0x1bb   : > { %3846 = vmatpush1.bf16.msra.mxu0 %v3845_v0 }
 0x1bc   : > { %3847 = vmatprep.subr.bf16.mxu0 %v4336_v6 }
 0x1bd   : > { %3873 = vmatpush1.bf16.msra.mxu1 %v3872_v46 }
 0x1be   : > { %3874 = vmatprep.subr.bf16.mxu1 %v4336_v6 }
 0x1bf   : > { %3849 = vmatpush1.bf16.msra.mxu0 %v3848_v50 }
 0x1c0   : > { %3850 = vmatprep.subr.bf16.mxu0 %v4336_v6 }
 0x1c1   : > { %3876 = vmatpush1.bf16.msra.mxu1 %v3875_v52 }
 0x1c2   : > { %3877 = vmatprep.subr.bf16.mxu1 %v4336_v6 }
 0x1c3   : > { %3852 = vmatpush1.bf16.msra.mxu0 %v3851_v58 }
 0x1c5   : > { %3879 = vmatpush1.bf16.msra.mxu1 %v3878_v59 }
 0x1c6   : > { %2594 = vmatmul.mubr.f32.vlgmr.msra.gmra.mrb[0].mxu0 %v2520_v61 }
 0x1c8   : > { %2685 = vmatmul.mubr.f32.vlgmr.msra.gmra.mrb[0].mxu1 %v2520_v61 }
 0x299   : > { %v2595_v2 = vpop.f32.mrb[0].mxu0 }
 0x29a   : > { %v2599_v4 = vadd.f32 %v2595_v2, %v2515_v63  ;;  %v2597_v5 = vpop.f32.mrb[1].mxu0 }
 0x29b   : > { %v2686_v7 = vpop.f32.mrb[0].mxu1 }
 0x29c   : > { %2600 = vst [vmem:[#allocation2] sm:$0x1] %v2599_v4  ;;  %v2690_v8 = vadd.f32 %v2686_v7, %v2601_v3  ;;  %v2688_v9 = vpop.f32.mrb[1].mxu1 }
 0x29e   : > { %2691 = vst [vmem:[#allocation3] sm:$0x1] %v2690_v8 }
 0x29f PF: > { %p2692_p6 = scmp.eq.s32.totalorder %s4313_s28, 1 }
 0x2a1   : > { %p2693_p8 = pnand %p2692_p6, %p2504_p2 }
 0x2a2   : > { %v2715_v6 = vld [vmem:[%s5298_s5] sm:$0xff] (!%p2693_p8)  ;;  %v2716_v10 = vld [vmem:[%s5298_s5 + $0x8] sm:$0xff] (!%p2693_p8)  ;;  %v2717_v11 = vld [vmem:[%s5298_s5 + $0x10] sm:$0xff] (!%p2693_p8)  ;;  %v4337_v12 = vmov (!%p2693_p8), 0.0|0.0   ;;  %vm4338_vm2 = vmmov (!%p2693_p8), 0   ;;  %v4339_v15 = vmov (!%p2693_p8), 0.0   ;;  %v2708_v39 = vlaneseq (!%p2693_p8) }
 0x2a3   : > { %2696 = sbr.rel (%p2693_p8) target bundleno = 954 (0x3ba), region = 60  ;;  %3880 = vmatprep.subr.bf16.mxu0 (!%p2693_p8), %v4337_v12  ;;  %v3881_v13 = vpack.c.bf16 (!%p2693_p8), %v2716_v10, %v2715_v6  ;;  %v2718_v14 = vld [vmem:[%s5298_s5 + $0x18] sm:$0xff] (!%p2693_p8)  ;;  %3823 = vmatprep.mubr.msk.f32.mxu0 (!%p2693_p8), %vm4338_vm2, %v4339_v15  ;;  %v2719_v17 = vld [vmem:[%s5298_s5 + $0x20] sm:$0xff] (!%p2693_p8)  ;;  %v2720_v18 = vld [vmem:[%s5298_s5 + $0x28] sm:$0xff] (!%p2693_p8)  ;;  %vm2713_vm3 = vcmask (!%p2693_p8), 1040384  }
 0x2a4   : > { %v3884_v16 = vpack.c.bf16 (!%p2693_p8), %v2718_v14, %v2717_v11  ;;  %v3887_v19 = vpack.c.bf16 (!%p2693_p8), %v2720_v18, %v2719_v17  ;;  %v2721_v20 = vld [vmem:[%s5298_s5 + $0x30] sm:$0xff] (!%p2693_p8)  ;;  %v2722_v21 = vld [vmem:[%s5298_s5 + $0x38] sm:$0xff] (!%p2693_p8)  ;;  %v5037_v22 = vld [vmem:[%s5295_s2] sm:$0x1] (!%p2693_p8)  ;;  %v2709_v49 = vshrl.u32 (!%p2693_p8), %v2708_v39, 7 }
 0x2a5   : > { %3882 = vmatpush3.bf16.msra.mxu0 (!%p2693_p8), %v3881_v13  ;;  %v3890_v24 = vpack.c.bf16 (!%p2693_p8), %v2722_v21, %v2721_v20  ;;  %v2702_v26 = vmul.f32 (!%p2693_p8), 2.0, %v5037_v22  ;;  %v2723_v28 = vld [vmem:[%s5298_s5 + $0x40] sm:$0xff] (!%p2693_p8)  ;;  %v2724_v30 = vld [vmem:[%s5298_s5 + $0x48] sm:$0xff] (!%p2693_p8)  ;;  %v2699_v36 = vmul.f32 (!%p2693_p8), 256.0, %v5037_v22  ;;  %v2725_v41 = vld [vmem:[%s5298_s5 + $0x50] sm:$0xff] (!%p2693_p8) }
 0x2a6   : > { %3883 = vmatprep.subr.bf16.mxu0 (!%p2693_p8), %v4337_v12  ;;  %v2698_v32 = vld [vmem:[#allocation2] sm:$0x1] (!%p2693_p8)  ;;  %v3893_v34 = vpack.c.bf16 (!%p2693_p8), %v2724_v30, %v2723_v28  ;;  %v2726_v42 = vld [vmem:[%s5298_s5 + $0x58] sm:$0xff] (!%p2693_p8)  ;;  %v2701_v44 = vld [vmem:[#allocation3] sm:$0x1] (!%p2693_p8)  ;;  %v2710_v56 = vsub.s32 (!%p2693_p8), 0, %v2709_v49 }
 0x2a7   : > { %v2703_v38 = vmul.f32 (!%p2693_p8), %v2702_v26, %v2698_v32  ;;  %v3896_v0 = vpack.c.bf16 (!%p2693_p8), %v2726_v42, %v2725_v41  ;;  %v2705_v47 = vmul.f32 (!%p2693_p8), %v2699_v36, %v5037_v22  ;;  %v2727_v50 = vld [vmem:[%s5298_s5 + $0x60] sm:$0xff] (!%p2693_p8)  ;;  %v2728_v52 = vld [vmem:[%s5298_s5 + $0x68] sm:$0xff] (!%p2693_p8)  ;;  %v2729_v58 = vld [vmem:[%s5298_s5 + $0x70] sm:$0xff] (!%p2693_p8)  ;;  %v2700_v63 = vadd.f32 (!%p2693_p8), %v2699_v36, %v2698_v32 }
 0x2a8   : > { %v3899_v53 = vpack.c.bf16 (!%p2693_p8), %v2728_v52, %v2727_v50  ;;  %v2730_v59 = vld [vmem:[%s5298_s5 + $0x78] sm:$0xff] (!%p2693_p8)  ;;  %v4340_v11 = vmov (!%p2693_p8), 1966171168  }
 0x2a9   : > { %3885 = vmatpush3.bf16.msra.mxu0 (!%p2693_p8), %v3884_v16  ;;  %v2704_v46 = vadd.f32 (!%p2693_p8), %v2703_v38, %v2701_v44  ;;  %v3902_v61 = vpack.c.bf16 (!%p2693_p8), %v2730_v59, %v2729_v58  ;;  %v2812_v13 = vunpack.c.l.s4 (!%p2693_p8), %v4340_v11 }
 0x2aa   : > { %3886 = vmatprep.subr.bf16.mxu0 %v4337_v12 }
 0x2ab   : > { %v2706_v55 = vadd.f32 %v2705_v47, %v2704_v46  ;;  %v2813_v14 = vunpack.c.0.s8 %v2812_v13 }
 0x2ad   : > { %3888 = vmatpush3.bf16.msra.mxu0 %v3887_v19  ;;  %v2711_v2 = vrot.slane %v2706_v55, %v2710_v56  ;;  %v2816_v15 = vsub.s32 %v2813_v14, %v2709_v49 }
 0x2ae   : > { %3889 = vmatprep.subr.bf16.mxu0 %v4337_v12 }
 0x2af   : > { %v2714_v3 = vsel %vm2713_vm3, %v2700_v63, %v2711_v2 }
 0x2b1   : > { %3891 = vmatpush3.bf16.msra.mxu0 %v3890_v24  ;;  %v2831_v24 = vld [vmem:[%s5297_s4] sm:$0x1] }
 0x2b2   : > { %3892 = vmatprep.subr.bf16.mxu0 %v4337_v12 }
 0x2b5   : > { %3894 = vmatpush3.bf16.msra.mxu0 %v3893_v34 }
 0x2b6   : > { %3895 = vmatprep.subr.bf16.mxu0 %v4337_v12 }
 0x2b9   : > { %3897 = vmatpush3.bf16.msra.mxu0 %v3896_v0 }
 0x2ba   : > { %3898 = vmatprep.subr.bf16.mxu0 %v4337_v12 }
 0x2bd   : > { %3900 = vmatpush3.bf16.msra.mxu0 %v3899_v53 }
 0x2be   : > { %3901 = vmatprep.subr.bf16.mxu0 %v4337_v12  ;;  %v2807_v12 = vld [vmem:[%s5296_s3] sm:$0x1] }
 0x2c1   : > { %3903 = vmatpush3.bf16.msra.mxu0 %v3902_v61 }
 0x2c4   : > { %3824 = vmatmul.mubr.f32.vlgmr.msra.gmra.mrb[0].mxu0 %v2714_v3 }
 0x397   : > { %v2797_v4 = vpop.f32.mrb[0].mxu0 }
 0x398   : > { %v2801_v5 = vmul.f32 %v2797_v4, %v2797_v4  ;;  %v3825_v7 = vpop.f32.mrb[1].mxu0  ;;  %v2829_v21 = vsub.f32 %v5037_v22, %v2797_v4 }
 0x39a   : > { %v2803_v8 = vrot.slane %v2801_v5, 7 }
 0x39c   : > { %v2805_v9 = vsub.f32 %v2797_v4, %v2803_v8 }
 0x39e   : > { %v2806_v6 = vmax.f32 %v2805_v9, 0.0 }
 0x3a0   : > { %v2808_v10 = vadd.f32 1e-05, %v2806_v6 }
 0x3a2   : > { %4149 = vrsqrt.f32 %v2808_v10 }
 0x3ac   : > { %v4150_v16 = vpop.eup %4149 }
 0x3ad   : > { %v2817_v17 = vrot.slane %v4150_v16, %v2816_v15 }
 0x3af   : > { %v2818_v18 = vcombine.high %v2817_v17, %v2817_v17 }
 0x3b1   : > { %v2825_v19 = vrot.slane %v2818_v18, %v2816_v15 }
 0x3b3   : > { %v2827_v20 = vmul.f32 %v2825_v19, %v2807_v12 }
 0x3b5   : > { %2828 = vst [vmem:[#allocation4] sm:$0x1] %v2827_v20  ;;  %v2830_v26 = vmul.f32 %v2829_v21, %v2827_v20 }
 0x3b7   : > { %v2832_v28 = vadd.f32 %v2831_v24, %v2830_v26 }
 0x3b9   : > { %2833 = vst [vmem:[#allocation5] sm:$0x1] %v2832_v28 }
 0x3ba PF: > { %p3318_p9 = scmp.ne.s32.totalorder %s4313_s28, 1 }
 0x3bc   : > { %2836 = sbr.rel (%p3318_p9) target bundleno = 1022 (0x3fe), region = 64  ;;  %v5074_v30 = vld [vmem:[#allocation4] ss:$0 sm:$0xff] (!%p3318_p9) }
 0x3bd   : > { %v2844_v34 = vmul.f32 (!%p3318_p9), %v4892_v25, %v5074_v30  ;;  %v2845_v22 = vmul.f32 (!%p3318_p9), %v4890_v23, %v5074_v30  ;;  %v2846_v36 = vmul.f32 (!%p3318_p9), %v4896_v29, %v5074_v30  ;;  %v2847_v38 = vmul.f32 (!%p3318_p9), %v4894_v27, %v5074_v30 }
 0x3be   : > { %v2848_v39 = vmul.f32 (!%p3318_p9), %v4900_v33, %v5074_v30  ;;  %v2849_v41 = vmul.f32 (!%p3318_p9), %v4898_v31, %v5074_v30  ;;  %v2850_v42 = vmul.f32 (!%p3318_p9), %v4904_v37, %v5074_v30  ;;  %v2851_v25 = vmul.f32 (!%p3318_p9), %v4902_v35, %v5074_v30 }
 0x3bf   : > { %v2852_v47 = vmul.f32 (!%p3318_p9), %v4908_v43, %v5074_v30  ;;  %v2853_v52 = vmul.f32 (!%p3318_p9), %v4906_v40, %v5074_v30  ;;  %v2854_v43 = vmul.f32 (!%p3318_p9), %v4912_v48, %v5074_v30  ;;  %v2855_v59 = vmul.f32 (!%p3318_p9), %v4910_v45, %v5074_v30 }
 0x3c0   : > { %v5076_v32 = vld [vmem:[#allocation5] ss:$0 sm:$0xff] (!%p3318_p9)  ;;  %v2856_v61 = vmul.f32 (!%p3318_p9), %v4916_v54, %v5074_v30  ;;  %v2857_v17 = vmul.f32 (!%p3318_p9), %v4914_v51, %v5074_v30  ;;  %v2858_v19 = vmul.f32 (!%p3318_p9), %v4920_v60, %v5074_v30  ;;  %v2859_v24 = vmul.f32 (!%p3318_p9), %v4918_v57, %v5074_v30 }
 0x3c1   : > { %v5095_v23 = vadd.f32 (!%p3318_p9), %v5076_v32, %v2844_v34  ;;  %v5098_v29 = vadd.f32 (!%p3318_p9), %v5076_v32, %v2845_v22  ;;  %v5101_v27 = vadd.f32 (!%p3318_p9), %v5076_v32, %v2846_v36  ;;  %v5104_v33 = vadd.f32 (!%p3318_p9), %v5076_v32, %v2847_v38 }
 0x3c2   : > { %v5107_v31 = vadd.f32 (!%p3318_p9), %v5076_v32, %v2848_v39  ;;  %v5110_v37 = vadd.f32 (!%p3318_p9), %v5076_v32, %v2849_v41  ;;  %v5113_v35 = vadd.f32 (!%p3318_p9), %v5076_v32, %v2850_v42  ;;  %v5122_v50 = vadd.f32 (!%p3318_p9), %v5076_v32, %v2851_v25 }
 0x3c3   : > { %v3321_v44 = vmul.f32 -1.442695, %v5095_v23  ;;  %v3322_v0 = vmul.f32 -1.442695, %v5098_v29  ;;  %v3323_v46 = vmul.f32 -1.442695, %v5101_v27  ;;  %v5129_v56 = vadd.f32 %v5076_v32, %v2852_v47 }
 0x3c4   : > { %v3324_v49 = vmul.f32 -1.442695, %v5104_v33  ;;  %v3325_v53 = vmul.f32 -1.442695, %v5107_v31  ;;  %v3326_v55 = vmul.f32 -1.442695, %v5110_v37  ;;  %v5132_v58 = vadd.f32 %v5076_v32, %v2853_v52 }
 0x3c5   : > { %4151 = vpow2.f32 %v3321_v44  ;;  %v3327_v40 = vmul.f32 -1.442695, %v5113_v35  ;;  %v3328_v63 = vmul.f32 -1.442695, %v5122_v50  ;;  %v5143_v2 = vadd.f32 %v5076_v32, %v2854_v43 }
 0x3c6   : > { %4153 = vpow2.f32 %v3322_v0  ;;  %v5146_v3 = vadd.f32 %v5076_v32, %v2855_v59  ;;  %v3329_v48 = vmul.f32 -1.442695, %v5129_v56  ;;  %v5150_v45 = vadd.f32 %v5076_v32, %v2856_v61 }
 0x3c7   : > { %4155 = vpow2.f32 %v3323_v46  ;;  %v3330_v4 = vmul.f32 -1.442695, %v5132_v58  ;;  %v3331_v54 = vmul.f32 -1.442695, %v5143_v2  ;;  %v2860_v34 = vmul.f32 %v4924_v1, %v5074_v30 }
 0x3c8   : > { %4157 = vpow2.f32 %v3324_v49  ;;  %v3332_v5 = vmul.f32 -1.442695, %v5146_v3  ;;  %v3333_v7 = vmul.f32 -1.442695, %v5150_v45  ;;  %v5165_v36 = vadd.f32 %v5076_v32, %v2857_v17 }
 0x3c9   : > { %4159 = vpow2.f32 %v3325_v53  ;;  %v2861_v60 = vmul.f32 %v4922_v62, %v5074_v30  ;;  %v5170_v57 = vadd.f32 %v5076_v32, %v2858_v19  ;;  %v5173_v1 = vadd.f32 %v5076_v32, %v2859_v24 }
 0x3ca   : > { %4161 = vpow2.f32 %v3326_v55  ;;  %v5176_v0 = vadd.f32 %v5076_v32, %v2860_v34  ;;  %v3334_v30 = vmul.f32 -1.442695, %v5165_v36 }
 0x3cb   : > { %4163 = vpow2.f32 %v3327_v40  ;;  %v5180_v47 = vadd.f32 %v5076_v32, %v2861_v60  ;;  %v3335_v53 = vmul.f32 -1.442695, %v5170_v57  ;;  %v3336_v59 = vmul.f32 -1.442695, %v5173_v1 }
 0x3cc   : > { %4165 = vpow2.f32 %v3328_v63  ;;  %v3337_v32 = vmul.f32 -1.442695, %v5176_v0 }
 0x3cd   : > { %4167 = vpow2.f32 %v3329_v48 }
 0x3ce   : > { %4169 = vpow2.f32 %v3330_v4  ;;  %v3338_v4 = vmul.f32 -1.442695, %v5180_v47 }
 0x3cf   : > { %v4152_v8 = vpop.eup %4151  ;;  %4171 = vpow2.f32 %v3331_v54 }
 0x3d0   : > { %v4154_v9 = vpop.eup %4153  ;;  %v2941_v6 = vadd.f32 1.0, %v4152_v8  ;;  %4173 = vpow2.f32 %v3332_v5 }
 0x3d1   : > { %v4156_v10 = vpop.eup %4155  ;;  %v2942_v11 = vadd.f32 1.0, %v4154_v9  ;;  %4175 = vpow2.f32 %v3333_v7 }
 0x3d2   : > { %v4158_v13 = vpop.eup %4157  ;;  %4177 = vrcp.f32 %v2941_v6  ;;  %v2943_v14 = vadd.f32 1.0, %v4156_v10 }
 0x3d3   : > { %v4160_v15 = vpop.eup %4159  ;;  %4179 = vrcp.f32 %v2942_v11  ;;  %v2944_v16 = vadd.f32 1.0, %v4158_v13 }
 0x3d4   : > { %v4162_v18 = vpop.eup %4161  ;;  %4181 = vrcp.f32 %v2943_v14  ;;  %v2945_v12 = vadd.f32 1.0, %v4160_v15 }
 0x3d5   : > { %v4164_v20 = vpop.eup %4163  ;;  %4183 = vrcp.f32 %v2944_v16  ;;  %v2946_v21 = vadd.f32 1.0, %v4162_v18 }
 0x3d6   : > { %v4166_v26 = vpop.eup %4165  ;;  %4185 = vrcp.f32 %v2945_v12  ;;  %v2947_v28 = vadd.f32 1.0, %v4164_v20 }
 0x3d7   : > { %v4168_v22 = vpop.eup %4167  ;;  %4187 = vrcp.f32 %v2946_v21  ;;  %v2948_v51 = vadd.f32 1.0, %v4166_v26 }
 0x3d8   : > { %v4170_v38 = vpop.eup %4169  ;;  %4189 = vrcp.f32 %v2947_v28  ;;  %v2949_v39 = vadd.f32 1.0, %v4168_v22 }
 0x3d9   : > { %v4172_v41 = vpop.eup %4171  ;;  %4191 = vrcp.f32 %v2948_v51  ;;  %v2950_v42 = vadd.f32 1.0, %v4170_v38 }
 0x3da   : > { %v4174_v25 = vpop.eup %4173  ;;  %4193 = vrcp.f32 %v2949_v39  ;;  %v2951_v44 = vadd.f32 1.0, %v4172_v41 }
 0x3db   : > { %v4176_v46 = vpop.eup %4175  ;;  %4195 = vrcp.f32 %v2950_v42  ;;  %v2952_v62 = vadd.f32 1.0, %v4174_v25 }
 0x3dc   : > { %v4178_v49 = vpop.eup %4177  ;;  %4197 = vrcp.f32 %v2951_v44  ;;  %v2953_v52 = vadd.f32 1.0, %v4176_v46 }
 0x3dd   : > { %v4180_v55 = vpop.eup %4179  ;;  %v2995_v43 = vmul.f32 %v4178_v49, %v5095_v23  ;;  %4199 = vrcp.f32 %v2952_v62 }
 0x3de   : > { %v4182_v40 = vpop.eup %4181  ;;  %v2996_v61 = vmul.f32 %v4180_v55, %v5098_v29  ;;  %4201 = vrcp.f32 %v2953_v52 }
 0x3df   : > { %v4184_v63 = vpop.eup %4183  ;;  %3013 = vst [vmem:[%s4927_s8] sm:$0xff] %v2995_v43  ;;  %v2997_v48 = vmul.f32 %v4182_v40, %v5101_v27  ;;  %4203 = vpow2.f32 %v3334_v30 }
 0x3e0   : > { %v4186_v23 = vpop.eup %4185  ;;  %3014 = vst [vmem:[%s4927_s8 + $0x8] sm:$0xff] %v2996_v61  ;;  %v2998_v54 = vmul.f32 %v4184_v63, %v5104_v33  ;;  %4205 = vpow2.f32 %v3335_v53 }
 0x3e1   : > { %v4188_v5 = vpop.eup %4187  ;;  %3015 = vst [vmem:[%s4927_s8 + $0x10] sm:$0xff] %v2997_v48  ;;  %v2999_v29 = vmul.f32 %v4186_v23, %v5107_v31  ;;  %4207 = vpow2.f32 %v3336_v59 }
 0x3e2   : > { %v4190_v7 = vpop.eup %4189  ;;  %3016 = vst [vmem:[%s4927_s8 + $0x18] sm:$0xff] %v2998_v54  ;;  %v3000_v27 = vmul.f32 %v4188_v5, %v5110_v37  ;;  %4209 = vpow2.f32 %v3337_v32 }
 0x3e3   : > { %v4192_v8 = vpop.eup %4191  ;;  %3017 = vst [vmem:[%s4927_s8 + $0x20] sm:$0xff] %v2999_v29  ;;  %v3001_v9 = vmul.f32 %v4190_v7, %v5113_v35  ;;  %4211 = vpow2.f32 %v3338_v4 }
 0x3e4   : > { %v4194_v33 = vpop.eup %4193  ;;  %3018 = vst [vmem:[%s4927_s8 + $0x28] sm:$0xff] %v3000_v27  ;;  %v3002_v6 = vmul.f32 %v4192_v8, %v5122_v50 }
 0x3e5   : > { %v4196_v31 = vpop.eup %4195  ;;  %3019 = vst [vmem:[%s4927_s8 + $0x30] sm:$0xff] %v3001_v9  ;;  %v3003_v10 = vmul.f32 %v4194_v33, %v5129_v56 }
 0x3e6   : > { %v4198_v11 = vpop.eup %4197  ;;  %3020 = vst [vmem:[%s4927_s8 + $0x38] sm:$0xff] %v3002_v6  ;;  %v3004_v37 = vmul.f32 %v4196_v31, %v5132_v58 }
 0x3e7   : > { %v4200_v13 = vpop.eup %4199  ;;  %3021 = vst [vmem:[%s4927_s8 + $0x40] sm:$0xff] %v3003_v10  ;;  %v3005_v35 = vmul.f32 %v4198_v11, %v5143_v2 }
 0x3e8   : > { %v4202_v14 = vpop.eup %4201  ;;  %3022 = vst [vmem:[%s4927_s8 + $0x48] sm:$0xff] %v3004_v37  ;;  %v3006_v15 = vmul.f32 %v4200_v13, %v5146_v3 }
 0x3e9   : > { %v4204_v16 = vpop.eup %4203  ;;  %3023 = vst [vmem:[%s4927_s8 + $0x50] sm:$0xff] %v3005_v35  ;;  %v3007_v50 = vmul.f32 %v4202_v14, %v5150_v45 }
 0x3ea   : > { %v4206_v17 = vpop.eup %4205  ;;  %3024 = vst [vmem:[%s4927_s8 + $0x58] sm:$0xff] %v3006_v15  ;;  %v2954_v56 = vadd.f32 1.0, %v4204_v16 }
 0x3eb   : > { %v4208_v18 = vpop.eup %4207  ;;  %3025 = vst [vmem:[%s4927_s8 + $0x60] sm:$0xff] %v3007_v50  ;;  %v2955_v12 = vadd.f32 1.0, %v4206_v17 }
 0x3ec   : > { %v4210_v19 = vpop.eup %4209  ;;  %4213 = vrcp.f32 %v2954_v56  ;;  %v2956_v58 = vadd.f32 1.0, %v4208_v18 }
 0x3ed   : > { %v4212_v20 = vpop.eup %4211  ;;  %4215 = vrcp.f32 %v2955_v12  ;;  %v2957_v2 = vadd.f32 1.0, %v4210_v19 }
 0x3ee   : > { %4217 = vrcp.f32 %v2956_v58  ;;  %v2958_v3 = vadd.f32 1.0, %v4212_v20 }
 0x3ef   : > { %4219 = vrcp.f32 %v2957_v2 }
 0x3f0   : > { %4221 = vrcp.f32 %v2958_v3 }
 0x3f6   : > { %v4214_v45 = vpop.eup %4213 }
 0x3f7   : > { %v4216_v21 = vpop.eup %4215  ;;  %v3008_v24 = vmul.f32 %v4214_v45, %v5165_v36 }
 0x3f8   : > { %v4218_v26 = vpop.eup %4217  ;;  %v3009_v28 = vmul.f32 %v4216_v21, %v5170_v57 }
 0x3f9   : > { %v4220_v34 = vpop.eup %4219  ;;  %3026 = vst [vmem:[%s4927_s8 + $0x68] sm:$0xff] %v3008_v24  ;;  %v3010_v22 = vmul.f32 %v4218_v26, %v5173_v1 }
 0x3fa   : > { %v4222_v51 = vpop.eup %4221  ;;  %3027 = vst [vmem:[%s4927_s8 + $0x70] sm:$0xff] %v3009_v28  ;;  %v3011_v60 = vmul.f32 %v4220_v34, %v5176_v0 }
 0x3fb   : > { %3028 = vst [vmem:[%s4927_s8 + $0x78] sm:$0xff] %v3010_v22  ;;  %v3012_v38 = vmul.f32 %v4222_v51, %v5180_v47 }
 0x3fc   : > { %3029 = vst [vmem:[%s4927_s8 + $0x80] sm:$0xff] %v3011_v60 }
 0x3fd   : > { %3030 = vst [vmem:[%s4927_s8 + $0x88] sm:$0xff] %v3012_v38 }
 0x3fe PF: > { %s3039_s18 = smul.u32 %s4309_s27, %s4313_s28  ;;  %s3048_s21 = sshll.u32 %s4927_s8, 4  ;;  %s5226_s21 = int_to_ptr.vmem [resolvable:$true] %s3048_s21 }
 0x3ff   : > { %s4053_s20 = smul.u32 36, %s4317_s29  ;;  %s5317_s15 = sand.u32 1, %s4301_s25  }
 0x400   : > { %s3040_s9 = smul.u32 18, %s3039_s18  ;;  %s5235_s12 = scalar_lea.sflag [#allocation7], %s5317_s15 }
 0x401   : > { %s4223_s0 = scalar_lea.vmem %s5226_s21, 2304  ;;  %s4341_s27 = smov [#allocation6]  }
 0x402   : > { %s3045_s14 = sadd.s32 %s4053_s20, %s3040_s9  ;;  %p4224_p10 = scmp.ne.s32.totalorder %s5226_s21, %s4223_s0 }
 0x403   : > { %s3339_s13 = sshll.u32 %s3045_s14, 7  ;;  %s4227_s28 = sshll.u32 %s4341_s27, 4  ;;  %s4228_s28 = int_to_ptr.vmem [resolvable:$false] %s4227_s28 }
 0x404   : > { %s5231_s23 = scalar_lea.hbm %s5300_s7, %s3339_s13  ;;  %p4225_p11 = pnand %p4224_p10, %p4448_p5 }
 0x405   : > { %s4229_s29 = scalar_lea.vmem %s4228_s28, 4608  ;;  %p4230_p13 = scmp.lt.s32.totalorder %s5226_s21, %s4228_s28 }
 0x406   : > { %p4226_p12 = pneg %p4225_p11  ;;  %p4231_p0 = scmp.lt.s32.totalorder %s4229_s29, %s4223_s0 }
 0x408   : > { %p4232_p1 = por %p4231_p0, %p4230_p13 }
 0x40a   : > { %p4233_p2 = pnand %p4232_p1, %p4226_p12 }
 0x40c   : > { %4236 = shalt.err (!%p4233_p2)
}
 0x40d   : > { %s4237_s8 = scalar_lea.hbm %s5231_s23, 2304  ;;  %s4241_s9 = scalar_lea.hbm %s5300_s7, 9216 }
 0x40e   : > { %p4238_p3 = scmp.ne.s32.totalorder %s5231_s23, %s4237_s8  ;;  %p4242_p8 = scmp.lt.u32.totalorder %s5231_s23, %s5300_s7 }
 0x40f   : > { %p4243_p9 = scmp.lt.u32.totalorder %s4241_s9, %s4237_s8  ;;  %p4245_p11 = scmp.lt.u32.totalorder %s4237_s8, %s5231_s23 }
 0x410   : > { %p4239_p4 = pnand %p4238_p3, %p4448_p5 }
 0x411   : > { %p4244_p10 = por %p4243_p9, %p4242_p8 }
 0x412   : > { %p4240_p6 = pneg %p4239_p4 }
 0x413   : > { %p4246_p12 = por %p4245_p11, %p4244_p10 }
 0x415   : > { %p4247_p13 = pnand %p4246_p12, %p4240_p6 }
 0x417   : > { %4250 = shalt.err (!%p4247_p13)
}
 0x418   : > { %s4342_s0 = smov 128   ;;  %s4343_s16 = smov 8  }
 0x419   : > { %4054 = dma.vmem_to_hbm [thread:$0]  (%p4448_p5), %s5226_s21, 2304, %s5231_s23, %s5235_s12, %s4342_s0, %s4342_s0, %s4343_s16  }
 0x41a PF: > { %p4060_p0 = scmp.ge.s32.totalorder %s4333_s10, 2  ;;  %s3063_s22 = sand.u32 1, %s4297_s24  }
 0x41b   : > { %s3064_s15 = scalar_lea.sflag [#allocation7], %s3063_s22 }
 0x41c   : > { %p4057_p1 = pnand %p4060_p0, %p4457_p7 }
 0x41e   : > { %4292 = dma.done.wait (!%p4057_p1), %s3064_s15, 2304  }
 0x41f   : > { %4294 = vsyncadd (!%p4057_p1), %s3064_s15, 4294964992  ;;  %s20_s10 = sadd.s32 1, %s4333_s10   ;;  %s5318_s28 = sld [smem:[#allocation9_spill]] }
 0x420   : > { %p17_p2 = scmp.ge.s32.totalorder %s20_s10, 10   ;;  %s5319_s29 = sld [smem:[#allocation10_spill]] }
 0x421   : > { %s5320_s17 = sld [smem:[#allocation11_spill]]  ;;  %s5321_s8 = sld [smem:[#allocation12_spill]] }
 0x422   : > { %s5322_s9 = sld [smem:[#allocation13_spill]]  ;;  %s5323_s24 = smov %s4301_s25 }
 0x423   : > { %s5324_s25 = smov %s4305_s26  ;;  %s5325_s26 = smov %s4469_s11 }
 0x424   : > { %s5326_s27 = smov %s4321_s30  ;;  %19 = sbr.rel (!%p17_p2) target bundleno = 8 (0x8), region = 107 }
 0x427   : > { %s5327_s30 = smov %s5320_s17 }
 0x42b   :  { %3069 = vsyncpa [#allocation7], 1 }
 0x42c   :  { %3071 = vsyncpa [#allocation7 + $0x1], 1 }

</bundles_post_ra>
